<compile_context>
chip_gen: v5e
topology: v5e:2x2
jax: 0.10.0
libtpu: 0.0.40
codegen_flags: <defaults>
</compile_context>

<pallas_src>
import math

import jax
import jax.numpy as jnp
from jax import lax
from jax.experimental import pallas as pl
from jax.experimental.pallas import tpu as pltpu


# ----------------------------------------------------------------------------
# Fused kernel: conv projections -> 6 cross-attentions -> fusion MLP
# (one batch element per grid step; everything stays in VMEM)
# ----------------------------------------------------------------------------
def _gsit_fused_kernel(text_ref, audio_ref, video_ref,
                       wl_ref, wa_ref, wv_ref,
                       p1w_ref, p1b_ref, p2w_ref, p2b_ref,
                       o_lv_ref, o_la_ref, o_vl_ref, o_va_ref, o_al_ref, o_av_ref,
                       feat_ref, m_ref):
    def conv1d(x, w_ref):
        # x: (L, C_in); w_ref: (K, C_in, D). Valid conv, stride 1, no bias,
        # computed as K shifted-slice matmuls (in-kernel unfold, no im2col).
        K = w_ref.shape[0]
        L_out = x.shape[0] - K + 1
        acc = jnp.dot(x[0:L_out, :], w_ref[0], preferred_element_type=jnp.float32)
        for k in range(1, K):                                # static unroll, K <= 3
            acc = acc + jnp.dot(x[k:k + L_out, :], w_ref[k],
                                preferred_element_type=jnp.float32)
        return acc

    proj_l = conv1d(text_ref[0], wl_ref)                     # (Tl, D)
    proj_a = conv1d(audio_ref[0], wa_ref)                    # (Ta, D)
    proj_v = conv1d(video_ref[0], wv_ref)                    # (Tv, D)

    D = proj_l.shape[-1]
    scale = 1.0 / math.sqrt(D)

    seqs = {"l": proj_l, "v": proj_v, "a": proj_a}
    # Fold the attention scale into each query ONCE (each modality is a query
    # in exactly two attentions) instead of scaling six score matrices.
    queries = {m: seqs[m] * scale for m in seqs}

    def attn(q, kv):
        # scaled dot-product attention (scale already folded into q);
        # q: (Tq, D), kv: (Tk, D) acting as both K and V.
        s = lax.dot_general(q, kv, (((1,), (1,)), ((), ())),
                            preferred_element_type=jnp.float32)
        s = s - jnp.max(s, axis=-1, keepdims=True)
        p = jnp.exp(s)                                       # EUP slot
        inv = pl.reciprocal(jnp.sum(p, axis=-1, keepdims=True), approx=True)
        return jnp.dot(p * inv, kv, preferred_element_type=jnp.float32)

    plan = [("l", "v", o_lv_ref), ("l", "a", o_la_ref),
            ("v", "l", o_vl_ref), ("v", "a", o_va_ref),
            ("a", "l", o_al_ref), ("a", "v", o_av_ref)]

    lasts = []
    for tgt, src, out_ref in plan:
        o = attn(queries[tgt], seqs[src])
        out_ref[0] = o                                       # (T_tgt, D)
        lasts.append(o[-1:, :])                              # (1, D) last time step

    # post_fusion_layer_1 on concat(lasts): expressed as block-wise matmul
    # accumulation so the (1, 6D) concat never materializes (no lane shuffles,
    # no HBM round-trip).
    w1 = p1w_ref[...]                                        # (6D, D)
    z = p1b_ref[...]                                         # (1, D)
    for idx, last in enumerate(lasts):
        z = z + jnp.dot(last, w1[idx * D:(idx + 1) * D, :],
                        preferred_element_type=jnp.float32)
    z = jnp.maximum(z, 0.0)                                  # relu -> Feature_f
    feat_ref[0] = z                                          # (1, D)
    m_ref[0] = jnp.dot(z, p2w_ref[...],
                       preferred_element_type=jnp.float32) + p2b_ref[...]


# ----------------------------------------------------------------------------
# GsiT forward
# ----------------------------------------------------------------------------
def gsit_forward(params, input_ids, audio_feat, video_feat):
    # TODO(synk): BertModel.from_pretrained cannot be reproduced in-script; a
    # deterministic embedding table stands in for text.last_hidden_state.
    text_embedding = params["text_emb_table"][input_ids]     # (B, Lt, text_out)

    # F.dropout(..., training=False) == identity for every dropout in the model.
    B, Lt, Ct = text_embedding.shape
    _, La, Ca = audio_feat.shape
    _, Lv, Cv = video_feat.shape

    # One-time param prep: PyTorch Conv1d weight (C_out, C_in, K) -> (K, C_in, C_out)
    wl = jnp.transpose(params["proj_l_w"], (2, 1, 0))
    wa = jnp.transpose(params["proj_a_w"], (2, 1, 0))
    wv = jnp.transpose(params["proj_v_w"], (2, 1, 0))
    D = wl.shape[-1]
    Kl, Ka, Kv = wl.shape[0], wa.shape[0], wv.shape[0]
    Tl, Ta, Tv = Lt - Kl + 1, La - Ka + 1, Lv - Kv + 1

    def batch_blk(shape):    # per-batch block of a (B, x, y) array
        return pl.BlockSpec((1,) + shape, lambda b: (b, 0, 0))

    def shared_blk(shape):   # whole-array block, resident across the grid
        nd = len(shape)
        return pl.BlockSpec(shape, lambda b, _nd=nd: (0,) * _nd)

    outs = pl.pallas_call(
        _gsit_fused_kernel,
        grid=(B,),
        in_specs=[
            batch_blk((Lt, Ct)), batch_blk((La, Ca)), batch_blk((Lv, Cv)),
            shared_blk((Kl, Ct, D)), shared_blk((Ka, Ca, D)), shared_blk((Kv, Cv, D)),
            shared_blk((6 * D, D)), shared_blk((1, D)),
            shared_blk((D, 1)), shared_blk((1, 1)),
        ],
        out_shape=(
            jax.ShapeDtypeStruct((B, Tl, D), jnp.float32),   # l <- v
            jax.ShapeDtypeStruct((B, Tl, D), jnp.float32),   # l <- a
            jax.ShapeDtypeStruct((B, Tv, D), jnp.float32),   # v <- l
            jax.ShapeDtypeStruct((B, Tv, D), jnp.float32),   # v <- a
            jax.ShapeDtypeStruct((B, Ta, D), jnp.float32),   # a <- l
            jax.ShapeDtypeStruct((B, Ta, D), jnp.float32),   # a <- v
            jax.ShapeDtypeStruct((B, 1, D), jnp.float32),    # Feature_f
            jax.ShapeDtypeStruct((B, 1, 1), jnp.float32),    # M
        ),
        out_specs=(
            batch_blk((Tl, D)), batch_blk((Tl, D)),
            batch_blk((Tv, D)), batch_blk((Tv, D)),
            batch_blk((Ta, D)), batch_blk((Ta, D)),
            batch_blk((1, D)), batch_blk((1, 1)),
        ),
        compiler_params=pltpu.CompilerParams(
            dimension_semantics=("parallel",)),
    )(text_embedding, audio_feat, video_feat, wl, wa, wv,
      params["post1_w"], params["post1_b"], params["post2_w"], params["post2_b"])

    o_lv, o_la, o_vl, o_va, o_al, o_av, feat3, m3 = outs

    # torch-fidelity layout glue: CrossModalGraph split tensors are (T, B, D).
    split_output = [jnp.transpose(o, (1, 0, 2))
                    for o in (o_lv, o_la, o_vl, o_va, o_al, o_av)]
    res = {"M": m3[:, 0, :], "Feature_f": feat3[:, 0, :]}
    cat_split = [Tl, Tv, Ta]                                 # order: [l, v, a]
    return res, split_output, cat_split


# ----------------------------------------------------------------------------
# Deterministic parameter init + example run
# ----------------------------------------------------------------------------
def init_params(key, *, vocab, text_out, a_in, v_in, proj_dim, k_l, k_a, k_v):
    ks = jax.random.split(key, 8)
    s = 0.05
    return {
        "text_emb_table": s * jax.random.normal(ks[0], (vocab, text_out), jnp.float32),
        # PyTorch Conv1d weight layout: (C_out, C_in, K)
        "proj_l_w": s * jax.random.normal(ks[1], (proj_dim, text_out, k_l), jnp.float32),
        "proj_a_w": s * jax.random.normal(ks[2], (proj_dim, a_in, k_a), jnp.float32),
        "proj_v_w": s * jax.random.normal(ks[3], (proj_dim, v_in, k_v), jnp.float32),
        # Linear weights stored as (in, out) so the kernel uses x @ W directly.
        "post1_w": s * jax.random.normal(ks[4], (6 * proj_dim, proj_dim), jnp.float32),
        "post1_b": s * jax.random.normal(ks[5], (1, proj_dim), jnp.float32),
        "post2_w": s * jax.random.normal(ks[6], (proj_dim, 1), jnp.float32),
        "post2_b": s * jax.random.normal(ks[7], (1, 1), jnp.float32),
    }


if __name__ == "__main__":
    B = 2
    text_len, text_out = 8, 32     # BERT hidden stand-in
    a_len, a_in = 10, 5
    v_len, v_in = 12, 6
    proj_dim = 32
    k_l, k_a, k_v = 1, 3, 3
    vocab = 64

    key = jax.random.PRNGKey(0)
    k_ids, k_a_feat, k_v_feat, k_params = jax.random.split(key, 4)

    input_ids = jax.random.randint(k_ids, (B, text_len), 0, vocab)
    audio_feat = jax.random.normal(k_a_feat, (B, a_len, a_in), jnp.float32)
    video_feat = jax.random.normal(k_v_feat, (B, v_len, v_in), jnp.float32)

    params = init_params(k_params, vocab=vocab, text_out=text_out, a_in=a_in,
                         v_in=v_in, proj_dim=proj_dim, k_l=k_l, k_a=k_a, k_v=k_v)

    res, split_output, cat_split = gsit_forward(params, input_ids, audio_feat, video_feat)

    jax.block_until_ready(res["M"])
    jax.block_until_ready(res["Feature_f"])
    for s in split_output:
        jax.block_until_ready(s)

    assert res["M"].shape == (B, 1)
    assert res["Feature_f"].shape == (B, proj_dim)
    assert cat_split == [text_len - k_l + 1, v_len - k_v + 1, a_len - k_a + 1]
    print("KERNEL_OK")
</pallas_src>

<mosaic_0001>
module attributes {stable_mosaic.version = 11 : i64} {
  func.func @_gsit_fused_kernel(%arg0: i32, %arg1: memref<1x8x32xf32, #tpu.memory_space<vmem>>, %arg2: memref<1x10x5xf32, #tpu.memory_space<vmem>>, %arg3: memref<1x12x6xf32, #tpu.memory_space<vmem>>, %arg4: memref<1x32x32xf32, #tpu.memory_space<vmem>>, %arg5: memref<3x5x32xf32, #tpu.memory_space<vmem>>, %arg6: memref<3x6x32xf32, #tpu.memory_space<vmem>>, %arg7: memref<192x32xf32, #tpu.memory_space<vmem>>, %arg8: memref<1x32xf32, #tpu.memory_space<vmem>>, %arg9: memref<32x1xf32, #tpu.memory_space<vmem>>, %arg10: memref<1x1xf32, #tpu.memory_space<vmem>>, %arg11: memref<1x8x32xf32, #tpu.memory_space<vmem>>, %arg12: memref<1x8x32xf32, #tpu.memory_space<vmem>>, %arg13: memref<1x10x32xf32, #tpu.memory_space<vmem>>, %arg14: memref<1x10x32xf32, #tpu.memory_space<vmem>>, %arg15: memref<1x8x32xf32, #tpu.memory_space<vmem>>, %arg16: memref<1x8x32xf32, #tpu.memory_space<vmem>>, %arg17: memref<1x1x32xf32, #tpu.memory_space<vmem>>, %arg18: memref<1x1x1xf32, #tpu.memory_space<vmem>>) attributes {dimension_semantics = [#tpu.dimension_semantics<parallel>], iteration_bounds = array<i64: 2>, scalar_prefetch = 0 : i64, scratch_operands = 0 : i64, tpu.core_type = #tpu.core_type<tc>, window_params = [{transform_indices = @transform_0, window_bounds = array<i64: 1, 8, 32>}, {transform_indices = @transform_1, window_bounds = array<i64: 1, 10, 5>}, {transform_indices = @transform_2, window_bounds = array<i64: 1, 12, 6>}, {pipeline_mode = #tpu.pipeline_mode<synchronous>, transform_indices = @transform_3, window_bounds = array<i64: 1, 32, 32>}, {pipeline_mode = #tpu.pipeline_mode<synchronous>, transform_indices = @transform_4, window_bounds = array<i64: 3, 5, 32>}, {pipeline_mode = #tpu.pipeline_mode<synchronous>, transform_indices = @transform_5, window_bounds = array<i64: 3, 6, 32>}, {pipeline_mode = #tpu.pipeline_mode<synchronous>, transform_indices = @transform_6, window_bounds = array<i64: 192, 32>}, {pipeline_mode = #tpu.pipeline_mode<synchronous>, transform_indices = @transform_7, window_bounds = array<i64: 1, 32>}, {pipeline_mode = #tpu.pipeline_mode<synchronous>, transform_indices = @transform_8, window_bounds = array<i64: 32, 1>}, {pipeline_mode = #tpu.pipeline_mode<synchronous>, transform_indices = @transform_9, window_bounds = array<i64: 1, 1>}, {transform_indices = @transform_10, window_bounds = array<i64: 1, 8, 32>}, {transform_indices = @transform_11, window_bounds = array<i64: 1, 8, 32>}, {transform_indices = @transform_12, window_bounds = array<i64: 1, 10, 32>}, {transform_indices = @transform_13, window_bounds = array<i64: 1, 10, 32>}, {transform_indices = @transform_14, window_bounds = array<i64: 1, 8, 32>}, {transform_indices = @transform_15, window_bounds = array<i64: 1, 8, 32>}, {transform_indices = @transform_16, window_bounds = array<i64: 1, 1, 32>}, {transform_indices = @transform_17, window_bounds = array<i64: 1, 1, 1>}]} {
    %c0 = arith.constant 0 : index
    %c0_0 = arith.constant 0 : index
    %c0_1 = arith.constant 0 : index
    %0 = vector.load %arg1[%c0, %c0_0, %c0_1] : memref<1x8x32xf32, #tpu.memory_space<vmem>>, vector<1x8x32xf32>
    %1 = vector.shape_cast %0 : vector<1x8x32xf32> to vector<8x32xf32>
    %c0_2 = arith.constant 0 : index
    %c0_3 = arith.constant 0 : index
    %c0_4 = arith.constant 0 : index
    %2 = vector.load %arg4[%c0_2, %c0_3, %c0_4] : memref<1x32x32xf32, #tpu.memory_space<vmem>>, vector<1x32x32xf32>
    %3 = vector.shape_cast %2 : vector<1x32x32xf32> to vector<32x32xf32>
    %cst = arith.constant dense<0.000000e+00> : vector<8x32xf32>
    %4 = tpu.matmul %1, %3, %cst {dimension_numbers = #tpu.dot_dimension_numbers<[1], [0], [0], [1], [0, 0, 1, 1], [], []>} : vector<8x32xf32>, vector<32x32xf32>, vector<8x32xf32> -> vector<8x32xf32>
    %c0_5 = arith.constant 0 : index
    %c0_6 = arith.constant 0 : index
    %c0_7 = arith.constant 0 : index
    %5 = vector.load %arg2[%c0_5, %c0_6, %c0_7] : memref<1x10x5xf32, #tpu.memory_space<vmem>>, vector<1x10x5xf32>
    %6 = vector.shape_cast %5 : vector<1x10x5xf32> to vector<10x5xf32>
    %7 = vector.extract_strided_slice %6 {offsets = [0, 0], sizes = [8, 5], strides = [1, 1]} : vector<10x5xf32> to vector<8x5xf32>
    %c0_8 = arith.constant 0 : index
    %c0_9 = arith.constant 0 : index
    %c0_10 = arith.constant 0 : index
    %8 = vector.load %arg5[%c0_8, %c0_9, %c0_10] : memref<3x5x32xf32, #tpu.memory_space<vmem>>, vector<1x5x32xf32>
    %9 = vector.shape_cast %8 : vector<1x5x32xf32> to vector<5x32xf32>
    %cst_11 = arith.constant dense<0.000000e+00> : vector<8x32xf32>
    %10 = tpu.matmul %7, %9, %cst_11 {dimension_numbers = #tpu.dot_dimension_numbers<[1], [0], [0], [1], [0, 0, 1, 1], [], []>} : vector<8x5xf32>, vector<5x32xf32>, vector<8x32xf32> -> vector<8x32xf32>
    %11 = vector.extract_strided_slice %6 {offsets = [1, 0], sizes = [8, 5], strides = [1, 1]} : vector<10x5xf32> to vector<8x5xf32>
    %c1 = arith.constant 1 : index
    %c0_12 = arith.constant 0 : index
    %c0_13 = arith.constant 0 : index
    %12 = vector.load %arg5[%c1, %c0_12, %c0_13] : memref<3x5x32xf32, #tpu.memory_space<vmem>>, vector<1x5x32xf32>
    %13 = vector.shape_cast %12 : vector<1x5x32xf32> to vector<5x32xf32>
    %cst_14 = arith.constant dense<0.000000e+00> : vector<8x32xf32>
    %14 = tpu.matmul %11, %13, %cst_14 {dimension_numbers = #tpu.dot_dimension_numbers<[1], [0], [0], [1], [0, 0, 1, 1], [], []>} : vector<8x5xf32>, vector<5x32xf32>, vector<8x32xf32> -> vector<8x32xf32>
    %15 = arith.addf %10, %14 : vector<8x32xf32>
    %16 = vector.extract_strided_slice %6 {offsets = [2, 0], sizes = [8, 5], strides = [1, 1]} : vector<10x5xf32> to vector<8x5xf32>
    %c2 = arith.constant 2 : index
    %c0_15 = arith.constant 0 : index
    %c0_16 = arith.constant 0 : index
    %17 = vector.load %arg5[%c2, %c0_15, %c0_16] : memref<3x5x32xf32, #tpu.memory_space<vmem>>, vector<1x5x32xf32>
    %18 = vector.shape_cast %17 : vector<1x5x32xf32> to vector<5x32xf32>
    %cst_17 = arith.constant dense<0.000000e+00> : vector<8x32xf32>
    %19 = tpu.matmul %16, %18, %cst_17 {dimension_numbers = #tpu.dot_dimension_numbers<[1], [0], [0], [1], [0, 0, 1, 1], [], []>} : vector<8x5xf32>, vector<5x32xf32>, vector<8x32xf32> -> vector<8x32xf32>
    %20 = arith.addf %15, %19 : vector<8x32xf32>
    %c0_18 = arith.constant 0 : index
    %c0_19 = arith.constant 0 : index
    %c0_20 = arith.constant 0 : index
    %21 = vector.load %arg3[%c0_18, %c0_19, %c0_20] : memref<1x12x6xf32, #tpu.memory_space<vmem>>, vector<1x12x6xf32>
    %22 = vector.shape_cast %21 : vector<1x12x6xf32> to vector<12x6xf32>
    %23 = vector.extract_strided_slice %22 {offsets = [0, 0], sizes = [10, 6], strides = [1, 1]} : vector<12x6xf32> to vector<10x6xf32>
    %c0_21 = arith.constant 0 : index
    %c0_22 = arith.constant 0 : index
    %c0_23 = arith.constant 0 : index
    %24 = vector.load %arg6[%c0_21, %c0_22, %c0_23] : memref<3x6x32xf32, #tpu.memory_space<vmem>>, vector<1x6x32xf32>
    %25 = vector.shape_cast %24 : vector<1x6x32xf32> to vector<6x32xf32>
    %cst_24 = arith.constant dense<0.000000e+00> : vector<10x32xf32>
    %26 = tpu.matmul %23, %25, %cst_24 {dimension_numbers = #tpu.dot_dimension_numbers<[1], [0], [0], [1], [0, 0, 1, 1], [], []>} : vector<10x6xf32>, vector<6x32xf32>, vector<10x32xf32> -> vector<10x32xf32>
    %27 = vector.extract_strided_slice %22 {offsets = [1, 0], sizes = [10, 6], strides = [1, 1]} : vector<12x6xf32> to vector<10x6xf32>
    %c1_25 = arith.constant 1 : index
    %c0_26 = arith.constant 0 : index
    %c0_27 = arith.constant 0 : index
    %28 = vector.load %arg6[%c1_25, %c0_26, %c0_27] : memref<3x6x32xf32, #tpu.memory_space<vmem>>, vector<1x6x32xf32>
    %29 = vector.shape_cast %28 : vector<1x6x32xf32> to vector<6x32xf32>
    %cst_28 = arith.constant dense<0.000000e+00> : vector<10x32xf32>
    %30 = tpu.matmul %27, %29, %cst_28 {dimension_numbers = #tpu.dot_dimension_numbers<[1], [0], [0], [1], [0, 0, 1, 1], [], []>} : vector<10x6xf32>, vector<6x32xf32>, vector<10x32xf32> -> vector<10x32xf32>
    %31 = arith.addf %26, %30 : vector<10x32xf32>
    %32 = vector.extract_strided_slice %22 {offsets = [2, 0], sizes = [10, 6], strides = [1, 1]} : vector<12x6xf32> to vector<10x6xf32>
    %c2_29 = arith.constant 2 : index
    %c0_30 = arith.constant 0 : index
    %c0_31 = arith.constant 0 : index
    %33 = vector.load %arg6[%c2_29, %c0_30, %c0_31] : memref<3x6x32xf32, #tpu.memory_space<vmem>>, vector<1x6x32xf32>
    %34 = vector.shape_cast %33 : vector<1x6x32xf32> to vector<6x32xf32>
    %cst_32 = arith.constant dense<0.000000e+00> : vector<10x32xf32>
    %35 = tpu.matmul %32, %34, %cst_32 {dimension_numbers = #tpu.dot_dimension_numbers<[1], [0], [0], [1], [0, 0, 1, 1], [], []>} : vector<10x6xf32>, vector<6x32xf32>, vector<10x32xf32> -> vector<10x32xf32>
    %36 = arith.addf %31, %35 : vector<10x32xf32>
    %cst_33 = arith.constant 0.176776692 : f32
    %37 = vector.broadcast %cst_33 : f32 to vector<8x32xf32>
    %38 = arith.mulf %4, %37 : vector<8x32xf32>
    %cst_34 = arith.constant 0.176776692 : f32
    %39 = vector.broadcast %cst_34 : f32 to vector<10x32xf32>
    %40 = arith.mulf %36, %39 : vector<10x32xf32>
    %cst_35 = arith.constant 0.176776692 : f32
    %41 = vector.broadcast %cst_35 : f32 to vector<8x32xf32>
    %42 = arith.mulf %20, %41 : vector<8x32xf32>
    %cst_36 = arith.constant dense<0.000000e+00> : vector<8x10xf32>
    %43 = tpu.matmul %38, %36, %cst_36 {dimension_numbers = #tpu.dot_dimension_numbers<[1], [1], [0], [0], [0, 0, 1, 0], [], []>} : vector<8x32xf32>, vector<10x32xf32>, vector<8x10xf32> -> vector<8x10xf32>
    %cst_37 = arith.constant dense<0xFF800000> : vector<8xf32>
    %44 = vector.multi_reduction <maximumf>, %43, %cst_37 [1] : vector<8x10xf32> to vector<8xf32>
    %45 = vector.shape_cast %44 : vector<8xf32> to vector<8x1xf32>
    %46 = vector.broadcast %45 : vector<8x1xf32> to vector<8x10xf32>
    %47 = arith.subf %43, %46 : vector<8x10xf32>
    %48 = math.exp %47 : vector<8x10xf32>
    %cst_38 = arith.constant dense<0.000000e+00> : vector<8xf32>
    %49 = vector.multi_reduction <add>, %48, %cst_38 [1] : vector<8x10xf32> to vector<8xf32>
    %50 = vector.shape_cast %49 : vector<8xf32> to vector<8x1xf32>
    %51 = tpu.reciprocal %50 {approx = true} : vector<8x1xf32> -> vector<8x1xf32>
    %52 = vector.broadcast %51 : vector<8x1xf32> to vector<8x10xf32>
    %53 = arith.mulf %48, %52 : vector<8x10xf32>
    %cst_39 = arith.constant dense<0.000000e+00> : vector<8x32xf32>
    %54 = tpu.matmul %53, %36, %cst_39 {dimension_numbers = #tpu.dot_dimension_numbers<[1], [0], [0], [1], [0, 0, 1, 1], [], []>} : vector<8x10xf32>, vector<10x32xf32>, vector<8x32xf32> -> vector<8x32xf32>
    %c0_40 = arith.constant 0 : index
    %c0_41 = arith.constant 0 : index
    %c0_42 = arith.constant 0 : index
    %55 = vector.load %arg11[%c0_40, %c0_41, %c0_42] : memref<1x8x32xf32, #tpu.memory_space<vmem>>, vector<1x8x32xf32>
    %56 = vector.shape_cast %55 : vector<1x8x32xf32> to vector<8x32xf32>
    %57 = vector.shape_cast %54 : vector<8x32xf32> to vector<1x8x32xf32>
    tpu.vector_store %arg11[%c0_40, %c0_41, %c0_42], %57 {strides = array<i32>} : memref<1x8x32xf32, #tpu.memory_space<vmem>>, vector<1x8x32xf32>,
    %58 = vector.extract_strided_slice %54 {offsets = [7, 0], sizes = [1, 32], strides = [1, 1]} : vector<8x32xf32> to vector<1x32xf32>
    %cst_43 = arith.constant dense<0.000000e+00> : vector<8x8xf32>
    %59 = tpu.matmul %38, %20, %cst_43 {dimension_numbers = #tpu.dot_dimension_numbers<[1], [1], [0], [0], [0, 0, 1, 0], [], []>} : vector<8x32xf32>, vector<8x32xf32>, vector<8x8xf32> -> vector<8x8xf32>
    %cst_44 = arith.constant dense<0xFF800000> : vector<8xf32>
    %60 = vector.multi_reduction <maximumf>, %59, %cst_44 [1] : vector<8x8xf32> to vector<8xf32>
    %61 = vector.shape_cast %60 : vector<8xf32> to vector<8x1xf32>
    %62 = vector.broadcast %61 : vector<8x1xf32> to vector<8x8xf32>
    %63 = arith.subf %59, %62 : vector<8x8xf32>
    %64 = math.exp %63 : vector<8x8xf32>
    %cst_45 = arith.constant dense<0.000000e+00> : vector<8xf32>
    %65 = vector.multi_reduction <add>, %64, %cst_45 [1] : vector<8x8xf32> to vector<8xf32>
    %66 = vector.shape_cast %65 : vector<8xf32> to vector<8x1xf32>
    %67 = tpu.reciprocal %66 {approx = true} : vector<8x1xf32> -> vector<8x1xf32>
    %68 = vector.broadcast %67 : vector<8x1xf32> to vector<8x8xf32>
    %69 = arith.mulf %64, %68 : vector<8x8xf32>
    %cst_46 = arith.constant dense<0.000000e+00> : vector<8x32xf32>
    %70 = tpu.matmul %69, %20, %cst_46 {dimension_numbers = #tpu.dot_dimension_numbers<[1], [0], [0], [1], [0, 0, 1, 1], [], []>} : vector<8x8xf32>, vector<8x32xf32>, vector<8x32xf32> -> vector<8x32xf32>
    %c0_47 = arith.constant 0 : index
    %c0_48 = arith.constant 0 : index
    %c0_49 = arith.constant 0 : index
    %71 = vector.load %arg12[%c0_47, %c0_48, %c0_49] : memref<1x8x32xf32, #tpu.memory_space<vmem>>, vector<1x8x32xf32>
    %72 = vector.shape_cast %71 : vector<1x8x32xf32> to vector<8x32xf32>
    %73 = vector.shape_cast %70 : vector<8x32xf32> to vector<1x8x32xf32>
    tpu.vector_store %arg12[%c0_47, %c0_48, %c0_49], %73 {strides = array<i32>} : memref<1x8x32xf32, #tpu.memory_space<vmem>>, vector<1x8x32xf32>,
    %74 = vector.extract_strided_slice %70 {offsets = [7, 0], sizes = [1, 32], strides = [1, 1]} : vector<8x32xf32> to vector<1x32xf32>
    %cst_50 = arith.constant dense<0.000000e+00> : vector<10x8xf32>
    %75 = tpu.matmul %40, %4, %cst_50 {dimension_numbers = #tpu.dot_dimension_numbers<[1], [1], [0], [0], [0, 0, 1, 0], [], []>} : vector<10x32xf32>, vector<8x32xf32>, vector<10x8xf32> -> vector<10x8xf32>
    %cst_51 = arith.constant dense<0xFF800000> : vector<10xf32>
    %76 = vector.multi_reduction <maximumf>, %75, %cst_51 [1] : vector<10x8xf32> to vector<10xf32>
    %77 = vector.shape_cast %76 : vector<10xf32> to vector<10x1xf32>
    %78 = vector.broadcast %77 : vector<10x1xf32> to vector<10x8xf32>
    %79 = arith.subf %75, %78 : vector<10x8xf32>
    %80 = math.exp %79 : vector<10x8xf32>
    %cst_52 = arith.constant dense<0.000000e+00> : vector<10xf32>
    %81 = vector.multi_reduction <add>, %80, %cst_52 [1] : vector<10x8xf32> to vector<10xf32>
    %82 = vector.shape_cast %81 : vector<10xf32> to vector<10x1xf32>
    %83 = tpu.reciprocal %82 {approx = true} : vector<10x1xf32> -> vector<10x1xf32>
    %84 = vector.broadcast %83 : vector<10x1xf32> to vector<10x8xf32>
    %85 = arith.mulf %80, %84 : vector<10x8xf32>
    %cst_53 = arith.constant dense<0.000000e+00> : vector<10x32xf32>
    %86 = tpu.matmul %85, %4, %cst_53 {dimension_numbers = #tpu.dot_dimension_numbers<[1], [0], [0], [1], [0, 0, 1, 1], [], []>} : vector<10x8xf32>, vector<8x32xf32>, vector<10x32xf32> -> vector<10x32xf32>
    %c0_54 = arith.constant 0 : index
    %c0_55 = arith.constant 0 : index
    %c0_56 = arith.constant 0 : index
    %87 = vector.load %arg13[%c0_54, %c0_55, %c0_56] : memref<1x10x32xf32, #tpu.memory_space<vmem>>, vector<1x10x32xf32>
    %88 = vector.shape_cast %87 : vector<1x10x32xf32> to vector<10x32xf32>
    %89 = vector.shape_cast %86 : vector<10x32xf32> to vector<1x10x32xf32>
    tpu.vector_store %arg13[%c0_54, %c0_55, %c0_56], %89 {strides = array<i32>} : memref<1x10x32xf32, #tpu.memory_space<vmem>>, vector<1x10x32xf32>,
    %90 = vector.extract_strided_slice %86 {offsets = [9, 0], sizes = [1, 32], strides = [1, 1]} : vector<10x32xf32> to vector<1x32xf32>
    %cst_57 = arith.constant dense<0.000000e+00> : vector<10x8xf32>
    %91 = tpu.matmul %40, %20, %cst_57 {dimension_numbers = #tpu.dot_dimension_numbers<[1], [1], [0], [0], [0, 0, 1, 0], [], []>} : vector<10x32xf32>, vector<8x32xf32>, vector<10x8xf32> -> vector<10x8xf32>
    %cst_58 = arith.constant dense<0xFF800000> : vector<10xf32>
    %92 = vector.multi_reduction <maximumf>, %91, %cst_58 [1] : vector<10x8xf32> to vector<10xf32>
    %93 = vector.shape_cast %92 : vector<10xf32> to vector<10x1xf32>
    %94 = vector.broadcast %93 : vector<10x1xf32> to vector<10x8xf32>
    %95 = arith.subf %91, %94 : vector<10x8xf32>
    %96 = math.exp %95 : vector<10x8xf32>
    %cst_59 = arith.constant dense<0.000000e+00> : vector<10xf32>
    %97 = vector.multi_reduction <add>, %96, %cst_59 [1] : vector<10x8xf32> to vector<10xf32>
    %98 = vector.shape_cast %97 : vector<10xf32> to vector<10x1xf32>
    %99 = tpu.reciprocal %98 {approx = true} : vector<10x1xf32> -> vector<10x1xf32>
    %100 = vector.broadcast %99 : vector<10x1xf32> to vector<10x8xf32>
    %101 = arith.mulf %96, %100 : vector<10x8xf32>
    %cst_60 = arith.constant dense<0.000000e+00> : vector<10x32xf32>
    %102 = tpu.matmul %101, %20, %cst_60 {dimension_numbers = #tpu.dot_dimension_numbers<[1], [0], [0], [1], [0, 0, 1, 1], [], []>} : vector<10x8xf32>, vector<8x32xf32>, vector<10x32xf32> -> vector<10x32xf32>
    %c0_61 = arith.constant 0 : index
    %c0_62 = arith.constant 0 : index
    %c0_63 = arith.constant 0 : index
    %103 = vector.load %arg14[%c0_61, %c0_62, %c0_63] : memref<1x10x32xf32, #tpu.memory_space<vmem>>, vector<1x10x32xf32>
    %104 = vector.shape_cast %103 : vector<1x10x32xf32> to vector<10x32xf32>
    %105 = vector.shape_cast %102 : vector<10x32xf32> to vector<1x10x32xf32>
    tpu.vector_store %arg14[%c0_61, %c0_62, %c0_63], %105 {strides = array<i32>} : memref<1x10x32xf32, #tpu.memory_space<vmem>>, vector<1x10x32xf32>,
    %106 = vector.extract_strided_slice %102 {offsets = [9, 0], sizes = [1, 32], strides = [1, 1]} : vector<10x32xf32> to vector<1x32xf32>
    %cst_64 = arith.constant dense<0.000000e+00> : vector<8x8xf32>
    %107 = tpu.matmul %42, %4, %cst_64 {dimension_numbers = #tpu.dot_dimension_numbers<[1], [1], [0], [0], [0, 0, 1, 0], [], []>} : vector<8x32xf32>, vector<8x32xf32>, vector<8x8xf32> -> vector<8x8xf32>
    %cst_65 = arith.constant dense<0xFF800000> : vector<8xf32>
    %108 = vector.multi_reduction <maximumf>, %107, %cst_65 [1] : vector<8x8xf32> to vector<8xf32>
    %109 = vector.shape_cast %108 : vector<8xf32> to vector<8x1xf32>
    %110 = vector.broadcast %109 : vector<8x1xf32> to vector<8x8xf32>
    %111 = arith.subf %107, %110 : vector<8x8xf32>
    %112 = math.exp %111 : vector<8x8xf32>
    %cst_66 = arith.constant dense<0.000000e+00> : vector<8xf32>
    %113 = vector.multi_reduction <add>, %112, %cst_66 [1] : vector<8x8xf32> to vector<8xf32>
    %114 = vector.shape_cast %113 : vector<8xf32> to vector<8x1xf32>
    %115 = tpu.reciprocal %114 {approx = true} : vector<8x1xf32> -> vector<8x1xf32>
    %116 = vector.broadcast %115 : vector<8x1xf32> to vector<8x8xf32>
    %117 = arith.mulf %112, %116 : vector<8x8xf32>
    %cst_67 = arith.constant dense<0.000000e+00> : vector<8x32xf32>
    %118 = tpu.matmul %117, %4, %cst_67 {dimension_numbers = #tpu.dot_dimension_numbers<[1], [0], [0], [1], [0, 0, 1, 1], [], []>} : vector<8x8xf32>, vector<8x32xf32>, vector<8x32xf32> -> vector<8x32xf32>
    %c0_68 = arith.constant 0 : index
    %c0_69 = arith.constant 0 : index
    %c0_70 = arith.constant 0 : index
    %119 = vector.load %arg15[%c0_68, %c0_69, %c0_70] : memref<1x8x32xf32, #tpu.memory_space<vmem>>, vector<1x8x32xf32>
    %120 = vector.shape_cast %119 : vector<1x8x32xf32> to vector<8x32xf32>
    %121 = vector.shape_cast %118 : vector<8x32xf32> to vector<1x8x32xf32>
    tpu.vector_store %arg15[%c0_68, %c0_69, %c0_70], %121 {strides = array<i32>} : memref<1x8x32xf32, #tpu.memory_space<vmem>>, vector<1x8x32xf32>,
    %122 = vector.extract_strided_slice %118 {offsets = [7, 0], sizes = [1, 32], strides = [1, 1]} : vector<8x32xf32> to vector<1x32xf32>
    %cst_71 = arith.constant dense<0.000000e+00> : vector<8x10xf32>
    %123 = tpu.matmul %42, %36, %cst_71 {dimension_numbers = #tpu.dot_dimension_numbers<[1], [1], [0], [0], [0, 0, 1, 0], [], []>} : vector<8x32xf32>, vector<10x32xf32>, vector<8x10xf32> -> vector<8x10xf32>
    %cst_72 = arith.constant dense<0xFF800000> : vector<8xf32>
    %124 = vector.multi_reduction <maximumf>, %123, %cst_72 [1] : vector<8x10xf32> to vector<8xf32>
    %125 = vector.shape_cast %124 : vector<8xf32> to vector<8x1xf32>
    %126 = vector.broadcast %125 : vector<8x1xf32> to vector<8x10xf32>
    %127 = arith.subf %123, %126 : vector<8x10xf32>
    %128 = math.exp %127 : vector<8x10xf32>
    %cst_73 = arith.constant dense<0.000000e+00> : vector<8xf32>
    %129 = vector.multi_reduction <add>, %128, %cst_73 [1] : vector<8x10xf32> to vector<8xf32>
    %130 = vector.shape_cast %129 : vector<8xf32> to vector<8x1xf32>
    %131 = tpu.reciprocal %130 {approx = true} : vector<8x1xf32> -> vector<8x1xf32>
    %132 = vector.broadcast %131 : vector<8x1xf32> to vector<8x10xf32>
    %133 = arith.mulf %128, %132 : vector<8x10xf32>
    %cst_74 = arith.constant dense<0.000000e+00> : vector<8x32xf32>
    %134 = tpu.matmul %133, %36, %cst_74 {dimension_numbers = #tpu.dot_dimension_numbers<[1], [0], [0], [1], [0, 0, 1, 1], [], []>} : vector<8x10xf32>, vector<10x32xf32>, vector<8x32xf32> -> vector<8x32xf32>
    %c0_75 = arith.constant 0 : index
    %c0_76 = arith.constant 0 : index
    %c0_77 = arith.constant 0 : index
    %135 = vector.load %arg16[%c0_75, %c0_76, %c0_77] : memref<1x8x32xf32, #tpu.memory_space<vmem>>, vector<1x8x32xf32>
    %136 = vector.shape_cast %135 : vector<1x8x32xf32> to vector<8x32xf32>
    %137 = vector.shape_cast %134 : vector<8x32xf32> to vector<1x8x32xf32>
    tpu.vector_store %arg16[%c0_75, %c0_76, %c0_77], %137 {strides = array<i32>} : memref<1x8x32xf32, #tpu.memory_space<vmem>>, vector<1x8x32xf32>,
    %138 = vector.extract_strided_slice %134 {offsets = [7, 0], sizes = [1, 32], strides = [1, 1]} : vector<8x32xf32> to vector<1x32xf32>
    %c0_78 = arith.constant 0 : index
    %c0_79 = arith.constant 0 : index
    %139 = vector.load %arg7[%c0_78, %c0_79] : memref<192x32xf32, #tpu.memory_space<vmem>>, vector<192x32xf32>
    %c0_80 = arith.constant 0 : index
    %c0_81 = arith.constant 0 : index
    %140 = vector.load %arg8[%c0_80, %c0_81] : memref<1x32xf32, #tpu.memory_space<vmem>>, vector<1x32xf32>
    %141 = vector.extract_strided_slice %139 {offsets = [0, 0], sizes = [32, 32], strides = [1, 1]} : vector<192x32xf32> to vector<32x32xf32>
    %cst_82 = arith.constant dense<0.000000e+00> : vector<1x32xf32>
    %142 = tpu.matmul %58, %141, %cst_82 {dimension_numbers = #tpu.dot_dimension_numbers<[1], [0], [0], [1], [0, 0, 1, 1], [], []>} : vector<1x32xf32>, vector<32x32xf32>, vector<1x32xf32> -> vector<1x32xf32>
    %143 = arith.addf %140, %142 : vector<1x32xf32>
    %144 = vector.extract_strided_slice %139 {offsets = [32, 0], sizes = [32, 32], strides = [1, 1]} : vector<192x32xf32> to vector<32x32xf32>
    %cst_83 = arith.constant dense<0.000000e+00> : vector<1x32xf32>
    %145 = tpu.matmul %74, %144, %cst_83 {dimension_numbers = #tpu.dot_dimension_numbers<[1], [0], [0], [1], [0, 0, 1, 1], [], []>} : vector<1x32xf32>, vector<32x32xf32>, vector<1x32xf32> -> vector<1x32xf32>
    %146 = arith.addf %143, %145 : vector<1x32xf32>
    %147 = vector.extract_strided_slice %139 {offsets = [64, 0], sizes = [32, 32], strides = [1, 1]} : vector<192x32xf32> to vector<32x32xf32>
    %cst_84 = arith.constant dense<0.000000e+00> : vector<1x32xf32>
    %148 = tpu.matmul %90, %147, %cst_84 {dimension_numbers = #tpu.dot_dimension_numbers<[1], [0], [0], [1], [0, 0, 1, 1], [], []>} : vector<1x32xf32>, vector<32x32xf32>, vector<1x32xf32> -> vector<1x32xf32>
    %149 = arith.addf %146, %148 : vector<1x32xf32>
    %150 = vector.extract_strided_slice %139 {offsets = [96, 0], sizes = [32, 32], strides = [1, 1]} : vector<192x32xf32> to vector<32x32xf32>
    %cst_85 = arith.constant dense<0.000000e+00> : vector<1x32xf32>
    %151 = tpu.matmul %106, %150, %cst_85 {dimension_numbers = #tpu.dot_dimension_numbers<[1], [0], [0], [1], [0, 0, 1, 1], [], []>} : vector<1x32xf32>, vector<32x32xf32>, vector<1x32xf32> -> vector<1x32xf32>
    %152 = arith.addf %149, %151 : vector<1x32xf32>
    %153 = vector.extract_strided_slice %139 {offsets = [128, 0], sizes = [32, 32], strides = [1, 1]} : vector<192x32xf32> to vector<32x32xf32>
    %cst_86 = arith.constant dense<0.000000e+00> : vector<1x32xf32>
    %154 = tpu.matmul %122, %153, %cst_86 {dimension_numbers = #tpu.dot_dimension_numbers<[1], [0], [0], [1], [0, 0, 1, 1], [], []>} : vector<1x32xf32>, vector<32x32xf32>, vector<1x32xf32> -> vector<1x32xf32>
    %155 = arith.addf %152, %154 : vector<1x32xf32>
    %156 = vector.extract_strided_slice %139 {offsets = [160, 0], sizes = [32, 32], strides = [1, 1]} : vector<192x32xf32> to vector<32x32xf32>
    %cst_87 = arith.constant dense<0.000000e+00> : vector<1x32xf32>
    %157 = tpu.matmul %138, %156, %cst_87 {dimension_numbers = #tpu.dot_dimension_numbers<[1], [0], [0], [1], [0, 0, 1, 1], [], []>} : vector<1x32xf32>, vector<32x32xf32>, vector<1x32xf32> -> vector<1x32xf32>
    %158 = arith.addf %155, %157 : vector<1x32xf32>
    %cst_88 = arith.constant 0.000000e+00 : f32
    %159 = vector.broadcast %cst_88 : f32 to vector<1x32xf32>
    %160 = arith.maximumf %158, %159 : vector<1x32xf32>
    %c0_89 = arith.constant 0 : index
    %c0_90 = arith.constant 0 : index
    %c0_91 = arith.constant 0 : index
    %161 = vector.load %arg17[%c0_89, %c0_90, %c0_91] : memref<1x1x32xf32, #tpu.memory_space<vmem>>, vector<1x1x32xf32>
    %162 = vector.shape_cast %161 : vector<1x1x32xf32> to vector<1x32xf32>
    %163 = vector.shape_cast %160 : vector<1x32xf32> to vector<1x1x32xf32>
    tpu.vector_store %arg17[%c0_89, %c0_90, %c0_91], %163 {strides = array<i32>} : memref<1x1x32xf32, #tpu.memory_space<vmem>>, vector<1x1x32xf32>,
    %c0_92 = arith.constant 0 : index
    %c0_93 = arith.constant 0 : index
    %164 = vector.load %arg9[%c0_92, %c0_93] : memref<32x1xf32, #tpu.memory_space<vmem>>, vector<32x1xf32>
    %cst_94 = arith.constant dense<0.000000e+00> : vector<1x1xf32>
    %165 = tpu.matmul %160, %164, %cst_94 {dimension_numbers = #tpu.dot_dimension_numbers<[1], [0], [0], [1], [0, 0, 1, 1], [], []>} : vector<1x32xf32>, vector<32x1xf32>, vector<1x1xf32> -> vector<1x1xf32>
    %c0_95 = arith.constant 0 : index
    %c0_96 = arith.constant 0 : index
    %166 = vector.load %arg10[%c0_95, %c0_96] : memref<1x1xf32, #tpu.memory_space<vmem>>, vector<1x1xf32>
    %167 = arith.addf %165, %166 : vector<1x1xf32>
    %c0_97 = arith.constant 0 : index
    %c0_98 = arith.constant 0 : index
    %c0_99 = arith.constant 0 : index
    %168 = vector.load %arg18[%c0_97, %c0_98, %c0_99] : memref<1x1x1xf32, #tpu.memory_space<vmem>>, vector<1x1x1xf32>
    %169 = vector.shape_cast %168 : vector<1x1x1xf32> to vector<1x1xf32>
    %170 = vector.shape_cast %167 : vector<1x1xf32> to vector<1x1x1xf32>
    tpu.vector_store %arg18[%c0_97, %c0_98, %c0_99], %170 {strides = array<i32>} : memref<1x1x1xf32, #tpu.memory_space<vmem>>, vector<1x1x1xf32>,
    return
  }
  func.func @transform_0(%arg0: i32) -> (i32, i32, i32) {
    %c0_i32 = arith.constant 0 : i32
    %c0_i32_0 = arith.constant 0 : i32
    %c0_i32_1 = arith.constant 0 : i32
    return %arg0, %c0_i32, %c0_i32_0 : i32, i32, i32
  }
  func.func @transform_1(%arg0: i32) -> (i32, i32, i32) {
    %c0_i32 = arith.constant 0 : i32
    %c0_i32_0 = arith.constant 0 : i32
    %c0_i32_1 = arith.constant 0 : i32
    return %arg0, %c0_i32, %c0_i32_0 : i32, i32, i32
  }
  func.func @transform_2(%arg0: i32) -> (i32, i32, i32) {
    %c0_i32 = arith.constant 0 : i32
    %c0_i32_0 = arith.constant 0 : i32
    %c0_i32_1 = arith.constant 0 : i32
    return %arg0, %c0_i32, %c0_i32_0 : i32, i32, i32
  }
  func.func @transform_3(%arg0: i32) -> (i32, i32, i32) {
    %c0_i32 = arith.constant 0 : i32
    %c0_i32_0 = arith.constant 0 : i32
    %c0_i32_1 = arith.constant 0 : i32
    %c0_i32_2 = arith.constant 0 : i32
    return %c0_i32, %c0_i32_0, %c0_i32_1 : i32, i32, i32
  }
  func.func @transform_4(%arg0: i32) -> (i32, i32, i32) {
    %c0_i32 = arith.constant 0 : i32
    %c0_i32_0 = arith.constant 0 : i32
    %c0_i32_1 = arith.constant 0 : i32
    %c0_i32_2 = arith.constant 0 : i32
    return %c0_i32, %c0_i32_0, %c0_i32_1 : i32, i32, i32
  }
  func.func @transform_5(%arg0: i32) -> (i32, i32, i32) {
    %c0_i32 = arith.constant 0 : i32
    %c0_i32_0 = arith.constant 0 : i32
    %c0_i32_1 = arith.constant 0 : i32
    %c0_i32_2 = arith.constant 0 : i32
    return %c0_i32, %c0_i32_0, %c0_i32_1 : i32, i32, i32
  }
  func.func @transform_6(%arg0: i32) -> (i32, i32) {
    %c0_i32 = arith.constant 0 : i32
    %c0_i32_0 = arith.constant 0 : i32
    %c0_i32_1 = arith.constant 0 : i32
    return %c0_i32, %c0_i32_0 : i32, i32
  }
  func.func @transform_7(%arg0: i32) -> (i32, i32) {
    %c0_i32 = arith.constant 0 : i32
    %c0_i32_0 = arith.constant 0 : i32
    %c0_i32_1 = arith.constant 0 : i32
    return %c0_i32, %c0_i32_0 : i32, i32
  }
  func.func @transform_8(%arg0: i32) -> (i32, i32) {
    %c0_i32 = arith.constant 0 : i32
    %c0_i32_0 = arith.constant 0 : i32
    %c0_i32_1 = arith.constant 0 : i32
    return %c0_i32, %c0_i32_0 : i32, i32
  }
  func.func @transform_9(%arg0: i32) -> (i32, i32) {
    %c0_i32 = arith.constant 0 : i32
    %c0_i32_0 = arith.constant 0 : i32
    %c0_i32_1 = arith.constant 0 : i32
    return %c0_i32, %c0_i32_0 : i32, i32
  }
  func.func @transform_10(%arg0: i32) -> (i32, i32, i32) {
    %c0_i32 = arith.constant 0 : i32
    %c0_i32_0 = arith.constant 0 : i32
    %c0_i32_1 = arith.constant 0 : i32
    return %arg0, %c0_i32, %c0_i32_0 : i32, i32, i32
  }
  func.func @transform_11(%arg0: i32) -> (i32, i32, i32) {
    %c0_i32 = arith.constant 0 : i32
    %c0_i32_0 = arith.constant 0 : i32
    %c0_i32_1 = arith.constant 0 : i32
    return %arg0, %c0_i32, %c0_i32_0 : i32, i32, i32
  }
  func.func @transform_12(%arg0: i32) -> (i32, i32, i32) {
    %c0_i32 = arith.constant 0 : i32
    %c0_i32_0 = arith.constant 0 : i32
    %c0_i32_1 = arith.constant 0 : i32
    return %arg0, %c0_i32, %c0_i32_0 : i32, i32, i32
  }
  func.func @transform_13(%arg0: i32) -> (i32, i32, i32) {
    %c0_i32 = arith.constant 0 : i32
    %c0_i32_0 = arith.constant 0 : i32
    %c0_i32_1 = arith.constant 0 : i32
    return %arg0, %c0_i32, %c0_i32_0 : i32, i32, i32
  }
  func.func @transform_14(%arg0: i32) -> (i32, i32, i32) {
    %c0_i32 = arith.constant 0 : i32
    %c0_i32_0 = arith.constant 0 : i32
    %c0_i32_1 = arith.constant 0 : i32
    return %arg0, %c0_i32, %c0_i32_0 : i32, i32, i32
  }
  func.func @transform_15(%arg0: i32) -> (i32, i32, i32) {
    %c0_i32 = arith.constant 0 : i32
    %c0_i32_0 = arith.constant 0 : i32
    %c0_i32_1 = arith.constant 0 : i32
    return %arg0, %c0_i32, %c0_i32_0 : i32, i32, i32
  }
  func.func @transform_16(%arg0: i32) -> (i32, i32, i32) {
    %c0_i32 = arith.constant 0 : i32
    %c0_i32_0 = arith.constant 0 : i32
    %c0_i32_1 = arith.constant 0 : i32
    return %arg0, %c0_i32, %c0_i32_0 : i32, i32, i32
  }
  func.func @transform_17(%arg0: i32) -> (i32, i32, i32) {
    %c0_i32 = arith.constant 0 : i32
    %c0_i32_0 = arith.constant 0 : i32
    %c0_i32_1 = arith.constant 0 : i32
    return %arg0, %c0_i32, %c0_i32_0 : i32, i32, i32
  }
}

</mosaic_0001>

<bundles_post_ra>
// kernel: tpu_custom_call.1
= control target key start
LH: loop header
LB: loop body
LE: loop exit
PB: predicated region body
PF: predicated region fallthrough
CT: control target
= control target key end

     0   :  { %s2770_s0 = inlined_call_operand.vmem [shape: f32[2,8,32], index: 0, kind: input, shape index: {}]   ;;  %s2771_s1 = inlined_call_operand.vmem [shape: f32[2,10,5], index: 1, kind: input, shape index: {}]   ;;  %s2772_s2 = inlined_call_operand.vmem [shape: f32[2,12,6], index: 2, kind: input, shape index: {}]   ;;  %s2773_s3 = inlined_call_operand.vmem [shape: f32[1,32,32], index: 3, kind: input, shape index: {}]   ;;  %s2774_s4 = inlined_call_operand.vmem [shape: f32[3,5,32], index: 4, kind: input, shape index: {}]   ;;  %s2775_s5 = inlined_call_operand.vmem [shape: f32[3,6,32], index: 5, kind: input, shape index: {}]   ;;  %s2776_s6 = inlined_call_operand.vmem [shape: f32[192,32], index: 6, kind: input, shape index: {}]   ;;  %s2777_s7 = inlined_call_operand.vmem [shape: f32[1,32], index: 7, kind: input, shape index: {}]   ;;  %s2778_s8 = inlined_call_operand.vmem [shape: f32[32,1], index: 8, kind: input, shape index: {}]   ;;  %s2779_s9 = inlined_call_operand.<no memory space> [shape: f32[1,1], index: 9, kind: input, shape index: {}]   ;;  %s2780_s10 = inlined_call_operand.hbm [shape: f32[2,8,32], index: 10, kind: output, shape index: {0}]   ;;  %s2781_s11 = inlined_call_operand.hbm [shape: f32[2,8,32], index: 11, kind: output, shape index: {1}]   ;;  %s2782_s12 = inlined_call_operand.vmem [shape: f32[2,10,32], index: 12, kind: output, shape index: {2}]   ;;  %s2783_s13 = inlined_call_operand.vmem [shape: f32[2,10,32], index: 13, kind: output, shape index: {3}]   ;;  %s2784_s14 = inlined_call_operand.hbm [shape: f32[2,8,32], index: 14, kind: output, shape index: {4}]   ;;  %s2785_s15 = inlined_call_operand.hbm [shape: f32[2,8,32], index: 15, kind: output, shape index: {5}]   ;;  %s2786_s16 = inlined_call_operand.hbm [shape: f32[2,1,32], index: 16, kind: output, shape index: {6}]   ;;  %s2787_s17 = inlined_call_operand.vmem [shape: f32[2,1,1], index: 17, kind: output, shape index: {7}]  }
   0x1   :  { %2799 = sst [smem:[#allocation21_spill]] %s2770_s0  ;;  %v23_v0 = vstv %s2779_s9 }
   0x2   :  { %2800 = sst [smem:[#allocation22_spill]] %s2771_s1  ;;  %24 = vst [vmem:[#allocation2] sm:$0x1] %v23_v0 }
   0x3   :  { %2801 = sst [smem:[#allocation23_spill]] %s2772_s2 }
   0x4   :  { %2802 = sst [smem:[#allocation24_spill]] %s2773_s3 }
   0x5   :  { %2803 = sst [smem:[#allocation25_spill]] %s2774_s4 }
   0x6   :  { %2804 = sst [smem:[#allocation26_spill]] %s2775_s5 }
   0x7   :  { %2805 = sst [smem:[#allocation27_spill]] %s2776_s6 }
   0x8   :  { %2806 = sst [smem:[#allocation28_spill]] %s2777_s7 }
   0x9   :  { %2807 = sst [smem:[#allocation29_spill]] %s2787_s17 }
   0xa   :  { %25 = vsyncpa [#allocation4], 0 }
   0xb   :  { %27 = vsyncpa [#allocation4 + $0x1], 0 }
   0xc   :  { %28 = vsyncpa [#allocation6], 0 }
   0xd   :  { %30 = vsyncpa [#allocation6 + $0x1], 0 }
   0xe   :  { %31 = vsyncpa [#allocation9], 0 }
   0xf   :  { %33 = vsyncpa [#allocation9 + $0x1], 0  ;;  %s2336_s26 = smov 0   ;;  %s2338_s27 = smov 0  }
  0x10   :  { %s2340_s28 = smov 0   ;;  %s2342_s29 = smov 0  }
  0x11 LB: > { %2808 = sst [smem:[#allocation14_spill]] %s2229_s26  ;;  %s2357_s9 = sadd.s32 4294967295, %s2241_s29   ;;  %s2241_s29 = sphi %s2342_s29, %s2834_s29   ;;  %s2237_s28 = sphi %s2340_s28, %s2836_s28   ;;  %s2233_s27 = sphi %s2338_s27, %s2838_s27   ;;  %s2229_s26 = sphi %s2336_s26, %s2837_s26  }
  0x12   : > { %2809 = sst [smem:[#allocation15_spill]] %s2237_s28  ;;  %s2788_s0 = sadd.s32 4294967294, %s2241_s29  }
  0x13   : > { %2810 = sst [smem:[#allocation16_spill]] %s2241_s29  ;;  %s2361_s30 = sadd.s32 1, %s2241_s29  }
  0x14   : > { %2811 = sst [smem:[#allocation17_spill]] %s2361_s30  ;;  %s271_s18 = sadd.s32 1, %s2237_s28 }
  0x15   : > { %s268_s19 = ssub.s32 %s2241_s29, %s2361_s30  ;;  %p281_p0 = scmp.ne.s32.totalorder %s2237_s28, %s2233_s27 }
  0x16   : > { %p269_p1 = scmp.eq.s32.totalorder %s268_s19, 0  ;;  %p282_p2 = scmp.eq.s32.totalorder %s2357_s9, 1 }
  0x17   : > { %p287_p3 = scmp.ne.s32.totalorder %s2233_s27, %s2229_s26  ;;  %p288_p4 = scmp.eq.s32.totalorder %s2788_s0, 1 }
  0x18   : > { %s2374_s1 = scalar_select %p269_p1, %s2237_s28, %s271_s18  }
  0x19   : > { %p2376_p5 = por %p282_p2, %p281_p0  ;;  %p2380_p6 = por %p288_p4, %p287_p3 }
  0x1a   : > { %2812 = sst [smem:[#allocation18_spill]] %s2374_s1  ;;  %p1887_p7 = scmp.ge.s32.totalorder %s2241_s29, 1 }
  0x1b   : > { %s2814_s21 = scalar_select %p2380_p6, 1, 0 }
  0x1c   : > { %p532_p8 = scmp.lt.s32.totalorder %s2241_s29, 3 }
  0x1d   : > { %2815 = sst [smem:[#allocation19_spill]] %s2814_s21 }
  0x1e   : > { %p533_p9 = pnand %p1887_p7, %p532_p8 }
  0x20   : > { %536 = sbr.rel (%p533_p9) target bundleno = 1017 (0x3f9), region = 60 }
  0x25   : > { %s2816_s4 = sld [smem:[#allocation25_spill]]  ;;  %vm695_vm0 = vcmask 1044480   ;;  %p625_p10 = scmp.lt.s32.totalorder %s2357_s9, 1  ;;  %vm746_vm1 = vcmask 1045504   ;;  %vm692_vm2 = vcmask 39936   ;;  %vm688_vm3 = vcmask 1046528  }
  0x26   : > { %s2817_s5 = sld [smem:[#allocation26_spill]]  ;;  %vm657_vm4 = vcmask 261120   ;;  %vm786_vm5 = vcmask 48128   ;;  %vm932_vm6 = vcmask 1041408   ;;  %vm979_vm7 = vcmask 64512   ;;  %s1504_s26 = sand.u32 1, %s2357_s9  }
  0x27   : > { %s2401_s22 = scalar_select %p625_p10, %s2357_s9, 1  ;;  %vm917_vm8 = vcmask 80896   ;;  %vm1050_vm9 = vcmask 58368   ;;  %vm1100_vm10 = vcmask 254976   ;;  %vm1467_vm11 = vcmask 253952  }
  0x28   : > { %s2818_s3 = sld [smem:[#allocation24_spill]]  ;;  %s2666_s0 = scalar_lea.sflag [#allocation6], %s1504_s26 }
  0x29   : > { %s2419_s30 = sshll.u32 %s2401_s22, 4  ;;  %s1892_s24 = sshll.u32 %s2401_s22, 3 }
  0x2a   : > { %s2819_s19 = sld [smem:[#allocation22_spill]]  ;;  %s648_s21 = scalar_lea.vmem %s2783_s13, %s2419_s30 }
  0x2b   : > { %v683_v1 = vld [vmem:[%s2816_s4] sm:$0x1f]  ;;  %v1907_v2 = vld [vmem:[%s2816_s4 + $0x10] sm:$0x1f]  ;;  %v1902_v6 = vld [vmem:[%s2816_s4 + $0x8] sm:$0x1f] }
  0x2c   : > { %1905 = vmatpush.msk.msra.mxu2 %vm695_vm0, %v683_v1  ;;  %v778_v3 = vld [vmem:[%s2817_s5] sm:$0x3f]  ;;  %v1917_v4 = vld [vmem:[%s2817_s5 + $0x10] sm:$0x3f]  ;;  %1908 = vmatpush.msk.msra.mxu3 %vm695_vm0, %v1907_v2  ;;  %v1910_v8 = vld [vmem:[%s2817_s5 + $0x8] sm:$0x3f] }
  0x2d   : > { %1903 = vmatpush.msk.msra.mxu1 %vm695_vm0, %v1902_v6  ;;  %s2820_s2 = sld [smem:[#allocation23_spill]] }
  0x2e   : > { %1914 = vmatpush.msk.msrb.mxu2 %vm746_vm1, %v778_v3  ;;  %v656_v5 = vld [vmem:[%s2818_s3 + $0x18] sm:$0xff]  ;;  %v655_v7 = vld [vmem:[%s2818_s3 + $0x10] sm:$0xff]  ;;  %1918 = vmatpush.msk.msrb.mxu3 %vm746_vm1, %v1917_v4  ;;  %v654_v9 = vld [vmem:[%s2818_s3 + $0x8] sm:$0xff]  ;;  %s2821_s29 = sld [smem:[#allocation21_spill]] }
  0x2f   : > { %673 = vmatpush.msra.mxu0 %v656_v5  ;;  %1911 = vmatpush.msk.msrb.mxu1 %vm746_vm1, %v1910_v8  ;;  %v653_v12 = vld [vmem:[%s2818_s3] sm:$0xff]  ;;  %s2822_s6 = sld [smem:[#allocation27_spill]] }
  0x30   : > { %s633_s4 = scalar_lea.vmem %s2819_s19, %s2419_s30  ;;  %s643_s19 = scalar_lea.vmem %s2782_s12, %s2419_s30 }
  0x31   : > { %674 = vmatpush.msra.mxu0 %v655_v7  ;;  %v681_v10 = vld [vmem:[%s633_s4] sm:$0xff]  ;;  %v682_v11 = vld [vmem:[%s633_s4 + $0x8] sm:$0x3]  ;;  %s2559_s4 = sand.u32 1, %s2233_s27   ;;  %s2823_s7 = sld [smem:[#allocation28_spill]] }
  0x32   : > { %v689_v13 = vrot.slane %v681_v10, 1  ;;  %v690_v14 = vrot.slane %v682_v11, 1  ;;  %1906 = vmatmul.msk.f32.vlgmr.msra.gmra.mxu2 %vm692_vm2, %v681_v10  ;;  %v747_v15 = vrot.slane %v681_v10, 2  ;;  %v748_v16 = vrot.slane %v682_v11, 2  ;;  %s2571_s25 = sshll.u32 %s2559_s4, 3 }
  0x33   : > { %s638_s5 = scalar_lea.vmem %s2820_s2, %s2419_s30  ;;  %675 = vmatpush.msra.mxu0 %v654_v9  ;;  %s613_s18 = scalar_lea.vmem [#allocation8], %s2571_s25 }
  0x34   : > { %s628_s17 = scalar_lea.vmem %s2821_s29, %s1892_s24  ;;  %v776_v17 = vld [vmem:[%s638_s5] sm:$0xff]  ;;  %v777_v18 = vld [vmem:[%s638_s5 + $0x8] sm:$0xf]  ;;  %v749_v20 = vsel %vm746_vm1, %v747_v15, %v748_v16  ;;  %v691_v21 = vsel %vm688_vm3, %v689_v13, %v690_v14  ;;  %s2796_s5 = scalar_lea.vmem [#allocation3], %s2571_s25 }
  0x35   : > { %v652_v19 = vld [vmem:[%s628_s17] sm:$0xff]  ;;  %676 = vmatpush.msra.mxu0 %v653_v12  ;;  %1909 = vmatmul.msk.f32.vlgmr.msra.gmra.mxu3 %vm692_vm2, %v749_v20  ;;  %v783_v22 = vrot.slane %v776_v17, 1  ;;  %v784_v23 = vrot.slane %v777_v18, 1  ;;  %v849_v24 = vrot.slane %v776_v17, 2  ;;  %v850_v25 = vrot.slane %v777_v18, 2  ;;  %s585_s17 = scalar_lea.vmem [#allocation5], %s2571_s25 }
  0x36   : > { %1904 = vmatmul.msk.f32.vlgmr.msra.gmra.mxu1 %vm692_vm2, %v691_v21  ;;  %1901 = vmatmul.msk.f32.vlgmr.msra.gmra.mxu0 %vm657_vm4, %v652_v19  ;;  %s606_s24 = scalar_lea.vmem [#allocation7], %s2571_s25  ;;  %s1558_s29 = sshll.u32 %s585_s17, 4  ;;  %s1559_s29 = int_to_ptr.vmem [resolvable:$true] %s1558_s29 }
  0x37   : > { %v851_v26 = vsel %vm746_vm1, %v849_v24, %v850_v25  ;;  %v785_v27 = vsel %vm688_vm3, %v783_v22, %v784_v23  ;;  %s2641_s30 = sshll.u32 %s606_s24, 4 }
  0x38   : > { %2824 = sst [smem:[#allocation20_spill]] %s2641_s30 }
  0x3a   : > { %1915 = vmatmul.msk.f32.vlgmr.msrb.gmra.mxu2 %vm786_vm5, %v776_v17 }
  0x3d   : > { %1919 = vmatmul.msk.f32.vlgmr.msrb.gmra.mxu3 %vm786_vm5, %v851_v26 }
  0x3e   : > { %1912 = vmatmul.msk.f32.vlgmr.msrb.gmra.mxu1 %vm786_vm5, %v785_v27 }
  0x42   : > { %1916 = vmatmul.msk.f32.gmra.mxu2 %vm786_vm5, %v777_v18 }
  0x45   : > { %1920 = vmatmul.msk.f32.gmra.mxu3 %vm786_vm5, %v850_v25 }
  0x46   : > { %1913 = vmatmul.msk.f32.gmra.mxu1 %vm786_vm5, %v784_v23 }
  0xb3   : > { %v716_v28 = vpop.f32.mrf.mxu1  ;;  %v2449_v29 = vpop.f32.mrf.mxu0 }
  0xb4   : > { %1929 = vmatpush.xpose.msk.msra.mxu3 %vm657_vm4, %v2449_v29  ;;  %v884_v34 = vmul.f32 0.17677669, %v2449_v29 }
  0xb5   : > { %v741_v30 = vpop.f32.mrf.mxu2 }
  0xb6   : > { %v742_v31 = vadd.f32 %v741_v30, %v716_v28 }
  0xb8   : > { %1939 = vmatpush.xpose.msk.msrb.mxu3 %vm657_vm4, %v2449_v29  ;;  %v772_v32 = vpop.f32.mrf.mxu3 }
  0xb9   : > { %v775_v33 = vadd.f32 %v772_v32, %v742_v31 }
  0xbb   : > { %v811_v35 = vpop.f32.mrf.mxu1  ;;  %1926 = vmatpush.xpose.msk.msra.mxu1 %vm657_vm4, %v775_v33  ;;  %1009 = vmatpush.msra.mxu2 %v775_v33  ;;  %v887_v47 = vmul.f32 0.17677669, %v775_v33 }
  0xbd   : > { %1168 = vmatpush.msrb.mxu2 %v775_v33  ;;  %v841_v36 = vpop.f32.mrf.mxu2 }
  0xbe   : > { %v842_v37 = vadd.f32 %v841_v36, %v811_v35  ;;  %1927 = vmatmul.msk.f32.vlgmr.msra.gmra.mxu1 %vm657_vm4, %v884_v34 }
  0xbf   : > { %1934 = vmatpush.xpose.msk.msrb.mxu1 %vm657_vm4, %v775_v33 }
  0xc0   : > { %v876_v38 = vpop.f32.mrf.mxu3 }
  0xc1   : > { %v2459_v39 = vadd.f32 %v876_v38, %v842_v37 }
  0xc3   : > { %v885_v40 = vmul.f32 0.17677669, %v2459_v39  ;;  %v814_v41 = vpop.f32.mrf.mxu1 }
  0xc5   : > { %1930 = vmatmul.msk.f32.vlgmr.msra.gmra.mxu3 %vm657_vm4, %v885_v40  ;;  %v844_v42 = vpop.f32.mrf.mxu2 }
  0xc6   : > { %v845_v43 = vadd.f32 %v844_v42, %v814_v41  ;;  %1935 = vmatmul.msk.f32.vlgmr.msrb.gmra.mxu1 %vm657_vm4, %v885_v40 }
  0xc8   : > { %v879_v44 = vpop.f32.mrf.mxu3 }
  0xc9   : > { %v2464_v45 = vadd.f32 %v879_v44, %v845_v43 }
  0xcb   : > { %1921 = vmatpush.xpose.msk.msrb.mxu0 %vm657_vm4, %v2464_v45  ;;  %1942 = vmatpush.xpose.msk.msra.mxu1 %vm657_vm4, %v2464_v45  ;;  %v886_v46 = vmul.f32 0.17677669, %v2464_v45 }
  0xcd   : > { %1931 = vmatmul.msk.f32.gmra.mxu3 %vm657_vm4, %v886_v46 }
  0xce   : > { %1936 = vmatmul.msk.f32.gmra.mxu1 %vm657_vm4, %v886_v46 }
  0xcf   : > { %1922 = vmatpush.xpose.msk.msrb.mxu0 %vm657_vm4, %v2459_v39  ;;  %1943 = vmatpush.xpose.msk.msra.mxu1 %vm657_vm4, %v2459_v39 }
  0xd2   : > { %1923 = vmatmul.msk.f32.vlgmr.msrb.gmra.mxu0 %vm657_vm4, %v884_v34 }
  0xd3   : > { %1924 = vmatpush.msk.msra.mxu0 %vm932_vm6, %v2464_v45 }
  0xd5   : > { %950 = vmatpush.msra.mxu0 %v2459_v39  ;;  %1940 = vmatmul.msk.f32.vlgmr.msrb.gmra.mxu3 %vm657_vm4, %v887_v47 }
  0xd6   : > { %1944 = vmatmul.msk.f32.vlgmr.msra.gmra.mxu1 %vm657_vm4, %v887_v47 }
  0xd7   : > { %1091 = vmatpush.msrb.mxu0 %v2449_v29 }
 0x13b   : > { %v976_v48 = vpop.f32.mrf.mxu1 }
 0x13c   : > { %v980_v59 = vsel %vm979_vm7, %v976_v48, -inf }
 0x143   : > { %v1119_v49 = vpop.f32.mrf.mxu1 }
 0x144   : > { %v1125_v57 = vsel %vm979_vm7, %v1119_v49, -inf }
 0x148   : > { %v1041_v50 = vpop.f32.mrf.mxu3 }
 0x149   : > { %v1047_v51 = vsel %vm979_vm7, %v1041_v50, -inf }
 0x14a   : > { %1048 = vmax.xlane.f32.xlu1 %v1047_v51 }
 0x14b   : > { %v1122_v52 = vpop.f32.mrf.mxu1 }
 0x14c   : > { %v1128_v61 = vsel %vm1050_vm9, %v1122_v52, -inf }
 0x14f   : > { %v914_v53 = vpop.f32.mrf.mxu0 }
 0x150   : > { %v1044_v54 = vpop.f32.mrf.mxu3  ;;  %v918_v55 = vsel %vm917_vm8, %v914_v53, -inf }
 0x151   : > { %919 = vmax.xlane.f32.xlu0 %v918_v55  ;;  %v1051_v56 = vsel %vm1050_vm9, %v1044_v54, -inf }
 0x152   : > { %1052 = vmax.xlane.f32.xlu2 %v1051_v56  ;;  %1126 = vmax.xlane.f32.xlu1 %v1125_v57 }
 0x153   : > { %v1253_v58 = vpop.f32.mrf.mxu1 }
 0x154   : > { %v1256_v60 = vsel %vm917_vm8, %v1253_v58, -inf }
 0x158   : > { %v1198_v62 = vpop.f32.mrf.mxu3 }
 0x159   : > { %981 = vmax.xlane.f32.xlu0 %v980_v59  ;;  %v1201_v63 = vsel %vm979_vm7, %v1198_v62, -inf }
 0x15a   : > { %1257 = vmax.xlane.f32.xlu1 %v1256_v60  ;;  %1129 = vmax.xlane.f32.xlu2 %v1128_v61 }
 0x161   : > { %1202 = vmax.xlane.f32.xlu0 %v1201_v63 }
 0x1bd   : > { %v1049_v0 = vpop.xlane.xlu1 %1048 }
 0x1be   : > { %v1054_v1 = vsub.f32 %v1041_v50, %v1049_v0  ;;  %v1293_v50 = vld [vmem:[%s2822_s6 + $0x10] sm:$0xff] }
 0x1c0   : > { %v1056_v2 = vmul.f32 1.442695, %v1054_v1 }
 0x1c2   : > { %2027 = vpow2.f32 %v1056_v2  ;;  %v1292_v2 = vld [vmem:[%s2822_s6 + $0x8] sm:$0xff] }
 0x1c4   : > { %v920_v3 = vpop.xlane.xlu0 %919 }
 0x1c5   : > { %v921_v4 = vsub.f32 %v914_v53, %v920_v3  ;;  %v1053_v5 = vpop.xlane.xlu2 %1052  ;;  %v1127_v6 = vpop.xlane.xlu1 %1126  ;;  %v1291_v3 = vld [vmem:[%s2822_s6] sm:$0xff] }
 0x1c6   : > { %v1131_v8 = vsub.f32 %v1119_v49, %v1127_v6  ;;  %v1055_v17 = vsub.f32 %v1044_v54, %v1053_v5  ;;  %v1294_v49 = vld [vmem:[%s2822_s6 + $0x18] sm:$0xff]  ;;  %v1297_v5 = vld [vmem:[%s2822_s6 + $0x30] sm:$0xff] }
 0x1c7   : > { %v922_v7 = vmul.f32 1.442695, %v921_v4  ;;  %1332 = vmatpush.msra.mxu3 %v1294_v49  ;;  %v1298_v4 = vld [vmem:[%s2822_s6 + $0x38] sm:$0xff] }
 0x1c8   : > { %v2492_v9 = vpop.eup %2027  ;;  %v1133_v11 = vmul.f32 1.442695, %v1131_v8  ;;  %v1058_v21 = vmul.f32 1.442695, %v1055_v17  ;;  %v1302_v6 = vld [vmem:[%s2822_s6 + $0x58] sm:$0xff]  ;;  %v1301_v8 = vld [vmem:[%s2822_s6 + $0x50] sm:$0xff] }
 0x1c9   : > { %2029 = vpow2.f32 %v922_v7  ;;  %v1060_v10 = vsel %vm979_vm7, %v2492_v9, 0.0  ;;  %1333 = vmatpush.msra.mxu3 %v1293_v50  ;;  %1382 = vmatpush.msrb.mxu1 %v1302_v6  ;;  %v1296_v7 = vld [vmem:[%s2822_s6 + $0x28] sm:$0xff]  ;;  %v1305_v17 = vld [vmem:[%s2822_s6 + $0x70] sm:$0xff] }
 0x1ca   : > { %1061 = vadd.xlane.f32.xlu1 %v1060_v10  ;;  %2031 = vpow2.f32 %v1133_v11  ;;  %v1300_v10 = vld [vmem:[%s2822_s6 + $0x48] sm:$0xff]  ;;  %v1299_v11 = vld [vmem:[%s2822_s6 + $0x40] sm:$0xff] }
 0x1cb   : > { %1334 = vmatpush.msra.mxu3 %v1292_v2  ;;  %1383 = vmatpush.msrb.mxu1 %v1301_v8 }
 0x1cc   : > { %v982_v12 = vpop.xlane.xlu0 %981 }
 0x1cd   : > { %v983_v13 = vsub.f32 %v976_v48, %v982_v12  ;;  %v1130_v14 = vpop.xlane.xlu2 %1129  ;;  %v1258_v22 = vpop.xlane.xlu1 %1257  ;;  %1335 = vmatpush.msra.mxu3 %v1291_v3  ;;  %1384 = vmatpush.msrb.mxu1 %v1300_v10  ;;  %v1310_v12 = vld [vmem:[%s2822_s6 + $0x98] sm:$0xff] }
 0x1ce   : > { %v1132_v15 = vsub.f32 %v1122_v52, %v1130_v14  ;;  %v1259_v27 = vsub.f32 %v1253_v58, %v1258_v22  ;;  %v1308_v14 = vld [vmem:[%s2822_s6 + $0x88] sm:$0xff]  ;;  %v1314_v22 = vld [vmem:[%s2822_s6 + $0xb8] sm:$0xff] }
 0x1cf   : > { %v2030_v16 = vpop.eup %2029  ;;  %v984_v18 = vmul.f32 1.442695, %v983_v13  ;;  %1385 = vmatpush.msrb.mxu1 %v1299_v11  ;;  %1432 = vmatpush.msrb.mxu3 %v1310_v12  ;;  %v1309_v13 = vld [vmem:[%s2822_s6 + $0x90] sm:$0xff] }
 0x1d0   : > { %v1135_v19 = vmul.f32 1.442695, %v1132_v15  ;;  %v924_v20 = vsel %vm917_vm8, %v2030_v16, 0.0  ;;  %v2032_v24 = vpop.eup %2031  ;;  %v1260_v34 = vmul.f32 1.442695, %v1259_v27  ;;  %v1306_v15 = vld [vmem:[%s2822_s6 + $0x78] sm:$0xff] }
 0x1d1   : > { %2033 = vpow2.f32 %v984_v18  ;;  %925 = vadd.xlane.f32.xlu2 %v924_v20  ;;  %v1137_v30 = vsel %vm979_vm7, %v2032_v24, 0.0  ;;  %1433 = vmatpush.msrb.mxu3 %v1309_v13  ;;  %v1304_v18 = vld [vmem:[%s2822_s6 + $0x68] sm:$0xff]  ;;  %v1303_v20 = vld [vmem:[%s2822_s6 + $0x60] sm:$0xff] }
 0x1d2   : > { %2035 = vpow2.f32 %v1135_v19 }
 0x1d3   : > { %2037 = vpow2.f32 %v1058_v21  ;;  %1434 = vmatpush.msrb.mxu3 %v1308_v14 }
 0x1d4   : > { %v1203_v23 = vpop.xlane.xlu0 %1202 }
 0x1d5   : > { %v1204_v25 = vsub.f32 %v1198_v62, %v1203_v23  ;;  %v1313_v23 = vld [vmem:[%s2822_s6 + $0xb0] sm:$0xff] }
 0x1d7   : > { %v2034_v26 = vpop.eup %2033  ;;  %v1205_v28 = vmul.f32 1.442695, %v1204_v25 }
 0x1d8   : > { %v986_v31 = vsel %vm979_vm7, %v2034_v26, 0.0  ;;  %v2036_v32 = vpop.eup %2035 }
 0x1d9   : > { %2039 = vpow2.f32 %v1205_v28  ;;  %1138 = vadd.xlane.f32.xlu2 %v1137_v30  ;;  %987 = vadd.xlane.f32.xlu0 %v986_v31  ;;  %v1140_v33 = vsel %vm1050_vm9, %v2036_v32, 0.0  ;;  %v2038_v35 = vpop.eup %2037 }
 0x1da   : > { %1141 = vadd.xlane.f32.xlu1 %v1140_v33  ;;  %2041 = vpow2.f32 %v1260_v34  ;;  %v1063_v37 = vsel %vm1050_vm9, %v2038_v35, 0.0 }
 0x1df   : > { %v2040_v36 = vpop.eup %2039 }
 0x1e0   : > { %v1207_v38 = vsel %vm979_vm7, %v2040_v36, 0.0  ;;  %v2042_v40 = vpop.eup %2041 }
 0x1e1   : > { %1064 = vadd.xlane.f32.xlu0 %v1063_v37  ;;  %1208 = vadd.xlane.f32.xlu2 %v1207_v38  ;;  %v1262_v41 = vsel %vm917_vm8, %v2042_v40, 0.0 }
 0x1e9   : > { %1263 = vadd.xlane.f32.xlu0 %v1262_v41  ;;  %v1471_v41 = vld [vmem:[%s2778_s8 + $0x10] sm:$0xff] }
 0x23d   : > { %v1062_v43 = vpop.xlane.xlu1 %1061 }
 0x244   : > { %v926_v42 = vpop.xlane.xlu2 %925 }
 0x245   : > { %2043 = vrcp.f32 %v926_v42  ;;  %v1470_v42 = vld [vmem:[%s2778_s8 + $0x8] sm:$0xff] }
 0x246   : > { %2045 = vrcp.f32 %v1062_v43  ;;  %v1469_v43 = vld [vmem:[%s2778_s8] sm:$0xff] }
 0x24b   : > { %v2044_v44 = vpop.eup %2043 }
 0x24c   : > { %v928_v46 = vmul.f32 %v2044_v44, %v2030_v16  ;;  %v988_v47 = vpop.xlane.xlu0 %987  ;;  %v1139_v48 = vpop.xlane.xlu2 %1138  ;;  %v1307_v16 = vld [vmem:[%s2822_s6 + $0x80] sm:$0xff] }
 0x24d   : > { %2047 = vrcp.f32 %v988_v47  ;;  %v2046_v51 = vpop.eup %2045  ;;  %1435 = vmatpush.msrb.mxu3 %v1307_v16  ;;  %v1315_v44 = vld [vmem:[%s2823_s7] sm:$0x1] }
 0x24e   : > { %1925 = vmatmul.msk.f32.vlgmr.msra.gmra.mxu0 %vm917_vm8, %v928_v46  ;;  %v1068_v53 = vmul.f32 %v2046_v51, %v2492_v9  ;;  %2049 = vrcp.f32 %v1139_v48  ;;  %v1295_v9 = vld [vmem:[%s2822_s6 + $0x20] sm:$0xff] }
 0x24f   : > { %1230 = vmatpush.msra.mxu0 %v2449_v29  ;;  %v1142_v29 = vpop.xlane.xlu1 %1141 }
 0x253   : > { %v2048_v52 = vpop.eup %2047 }
 0x254   : > { %v1065_v54 = vpop.xlane.xlu0 %1064  ;;  %v990_v55 = vmul.f32 %v2048_v52, %v2034_v26  ;;  %v1209_v56 = vpop.xlane.xlu2 %1208  ;;  %v1311_v26 = vld [vmem:[%s2822_s6 + $0xa0] sm:$0xff] }
 0x255   : > { %2051 = vrcp.f32 %v1065_v54  ;;  %v2050_v57 = vpop.eup %2049 }
 0x256   : > { %1932 = vmatmul.msk.f32.vlgmr.msrb.gmra.mxu0 %vm979_vm7, %v1068_v53  ;;  %1928 = vmatmul.msk.f32.vlgmr.msra.gmra.mxu2 %vm979_vm7, %v990_v55  ;;  %2053 = vrcp.f32 %v1142_v29  ;;  %v1145_v59 = vmul.f32 %v2050_v57, %v2032_v24  ;;  %v1312_v24 = vld [vmem:[%s2822_s6 + $0xa8] sm:$0xff] }
 0x257   : > { %1945 = vmatpush.msk.msra.mxu2 %vm932_vm6, %v2464_v45  ;;  %2055 = vrcp.f32 %v1209_v56  ;;  %1357 = vmatpush.msrb.mxu0 %v1298_v4 }
 0x259   : > { %1285 = vmatpush.msra.mxu2 %v2459_v39  ;;  %1358 = vmatpush.msrb.mxu0 %v1297_v5 }
 0x25b   : > { %v2052_v58 = vpop.eup %2051  ;;  %1359 = vmatpush.msrb.mxu0 %v1296_v7 }
 0x25c   : > { %v1069_v60 = vmul.f32 %v2052_v58, %v2038_v35  ;;  %v2054_v61 = vpop.eup %2053  ;;  %v1264_v62 = vpop.xlane.xlu0 %1263 }
 0x25d   : > { %v2056_v63 = vpop.eup %2055  ;;  %2057 = vrcp.f32 %v1264_v62  ;;  %v1146_v1 = vmul.f32 %v2054_v61, %v2036_v32  ;;  %1360 = vmatpush.msrb.mxu0 %v1295_v9 }
 0x25e   : > { %1933 = vmatmul.msk.f32.gmra.mxu0 %vm979_vm7, %v1069_v60  ;;  %1937 = vmatmul.msk.f32.vlgmr.msrb.gmra.mxu2 %vm979_vm7, %v1145_v59  ;;  %v1211_v0 = vmul.f32 %v2056_v63, %v2040_v36 }
 0x25f   : > { %1407 = vmatpush.msrb.mxu2 %v1306_v15 }
 0x261   : > { %1408 = vmatpush.msrb.mxu2 %v1305_v17 }
 0x263   : > { %v2058_v39 = vpop.eup %2057  ;;  %1409 = vmatpush.msrb.mxu2 %v1304_v18 }
 0x264   : > { %v1266_v45 = vmul.f32 %v2058_v39, %v2042_v40  ;;  %v1472_v40 = vld [vmem:[%s2778_s8 + $0x18] sm:$0xff] }
 0x265   : > { %1410 = vmatpush.msrb.mxu2 %v1303_v20  ;;  %1489 = vmatpush.msra.mxu1 %v1472_v40 }
 0x266   : > { %1938 = vmatmul.msk.f32.gmra.mxu2 %vm979_vm7, %v1146_v1  ;;  %1941 = vmatmul.msk.f32.vlgmr.msra.gmra.mxu0 %vm979_vm7, %v1211_v0 }
 0x267   : > { %1457 = vmatpush.msra.mxu0 %v1314_v22  ;;  %1490 = vmatpush.msra.mxu1 %v1471_v41 }
 0x269   : > { %1458 = vmatpush.msra.mxu0 %v1313_v23  ;;  %1491 = vmatpush.msra.mxu1 %v1470_v42 }
 0x26b   : > { %1459 = vmatpush.msra.mxu0 %v1312_v24  ;;  %1492 = vmatpush.msra.mxu1 %v1469_v43 }
 0x26d   : > { %1460 = vmatpush.msra.mxu0 %v1311_v26 }
 0x26e   : > { %1946 = vmatmul.msk.f32.vlgmr.msra.gmra.mxu2 %vm917_vm8, %v1266_v45 }
 0x2cb   : > { %v952_v19 = vpop.f32.mrf.mxu0 }
 0x2cc   : > { %955 = vst.msk [vmem:[%s2796_s5] sm:$0xff] %vm657_vm4, %v952_v19  ;;  %v1317_v21 = vrot.slane %v952_v19, 7  ;;  %s2645_s5 = sshll.u32 %s2357_s9, 3 }
 0x2cd   : > { %s1556_s1 = scalar_lea.hbm %s2781_s11, %s2645_s5  ;;  %s1590_s23 = scalar_lea.hbm %s2785_s15, %s2645_s5 }
 0x2ce   : > { %1947 = vmatmul.msk.f32.vlgmr.msra.gmra.mxu3 %vm657_vm4, %v1317_v21  ;;  %s1560_s30 = sshll.u32 %s1556_s1, 4  ;;  %s1561_s30 = int_to_ptr.hbm [resolvable:$true] %s1560_s30 }
 0x2d3   : > { %v1093_v25 = vpop.f32.mrf.mxu0 }
 0x2d4   : > { %1099 = vst.msk [vmem:[%s643_s19] sm:$0xff] %vm657_vm4, %v1093_v25 }
 0x2d9   : > { %v1011_v27 = vpop.f32.mrf.mxu2 }
 0x2da   : > { %1014 = vst.msk [vmem:[%s585_s17] sm:$0xff] %vm657_vm4, %v1011_v27  ;;  %v1342_v28 = vrot.slane %v1011_v27, 7 }
 0x2db   : > { %v1096_v30 = vpop.f32.mrf.mxu0 }
 0x2dc   : > { %1101 = vst.msk [vmem:[%s643_s19 + $0x8] sm:$0x3] %vm1100_vm10, %v1096_v30  ;;  %v1367_v31 = vrot.slane %v1096_v30, 1  ;;  %1948 = vmatmul.msk.f32.vlgmr.msrb.gmra.mxu0 %vm657_vm4, %v1342_v28  ;;  %s2664_s19 = sshll.u32 %s613_s18, 4  ;;  %s1593_s19 = int_to_ptr.vmem [resolvable:$true] %s2664_s19 }
 0x2de   : > { %1949 = vmatmul.msk.f32.vlgmr.msrb.gmra.mxu1 %vm657_vm4, %v1367_v31 }
 0x2e1   : > { %v1170_v32 = vpop.f32.mrf.mxu2 }
 0x2e2   : > { %1176 = vst.msk [vmem:[%s648_s21] sm:$0xff] %vm657_vm4, %v1170_v32 }
 0x2e3   : > { %v1232_v33 = vpop.f32.mrf.mxu0 }
 0x2e4   : > { %1235 = vst.msk [vmem:[%s606_s24] sm:$0xff] %vm657_vm4, %v1232_v33  ;;  %v1417_v34 = vrot.slane %v1232_v33, 7  ;;  %s2073_s24 = sshra.s32 %s1561_s30, 4  ;;  %s2074_s24 = int_to_ptr.hbm [resolvable:$true] %s2073_s24 }
 0x2e5   : > { %s2075_s28 = scalar_lea.hbm %s2074_s24, 8  ;;  %p2080_p0 = scmp.lt.s32.totalorder %s2074_s24, %s2781_s11 }
 0x2e6   : > { %1951 = vmatmul.msk.f32.vlgmr.msrb.gmra.mxu3 %vm657_vm4, %v1417_v34  ;;  %p2076_p11 = scmp.ne.s32.totalorder %s2074_s24, %s2075_s28 }
 0x2e8   : > { %p2077_p12 = pnand %p2076_p11, %p2376_p5 }
 0x2e9   : > { %v1173_v35 = vpop.f32.mrf.mxu2 }
 0x2ea   : > { %1177 = vst.msk [vmem:[%s648_s21 + $0x8] sm:$0x3] %vm1100_vm10, %v1173_v35  ;;  %v1392_v36 = vrot.slane %v1173_v35, 1  ;;  %s2798_s21 = scalar_lea.vmem [#allocation10], %s2559_s4  ;;  %p2078_p13 = pneg %p2077_p12 }
 0x2ec   : > { %1950 = vmatmul.msk.f32.vlgmr.msrb.gmra.mxu2 %vm657_vm4, %v1392_v36 }
 0x2f1   : > { %v1287_v37 = vpop.f32.mrf.mxu2 }
 0x2f2   : > { %1290 = vst.msk [vmem:[%s613_s18] sm:$0xff] %vm657_vm4, %v1287_v37  ;;  %v1442_v38 = vrot.slane %v1287_v37, 7 }
 0x2f4   : > { %1952 = vmatmul.msk.f32.vlgmr.msra.gmra.mxu0 %vm657_vm4, %v1442_v38 }
 0x351   : > { %v1337_v46 = vpop.f32.mrf.mxu3 }
 0x352   : > { %v1340_v48 = vadd.f32 %v1337_v46, %v1315_v44 }
 0x359   : > { %v1362_v47 = vpop.f32.mrf.mxu0 }
 0x35a   : > { %v1365_v49 = vadd.f32 %v1362_v47, %v1340_v48 }
 0x35b   : > { %v1387_v50 = vpop.f32.mrf.mxu1 }
 0x35c   : > { %v1390_v51 = vadd.f32 %v1387_v50, %v1365_v49 }
 0x369   : > { %v1437_v54 = vpop.f32.mrf.mxu3 }
 0x36f   : > { %v1412_v52 = vpop.f32.mrf.mxu2 }
 0x370   : > { %v1415_v53 = vadd.f32 %v1412_v52, %v1390_v51 }
 0x371   : > { %v1462_v29 = vpop.f32.mrf.mxu0 }
 0x372   : > { %v1440_v55 = vadd.f32 %v1437_v54, %v1415_v53 }
 0x374   : > { %v1465_v56 = vadd.f32 %v1462_v29, %v1440_v55 }
 0x376   : > { %v1466_v57 = vmax.f32 %v1465_v56, 0.0 }
 0x378   : > { %1468 = vst.msk [vmem:[%s2798_s21] sm:$0x1] %vm1467_vm11, %v1466_v57  ;;  %1953 = vmatmul.msk.f32.vlgmr.msra.gmra.mxu1 %vm657_vm4, %v1466_v57  ;;  %s2079_s21 = scalar_lea.hbm %s2781_s11, 16 }
 0x379   : > { %p2081_p1 = scmp.lt.s32.totalorder %s2079_s21, %s2075_s28 }
 0x37b   : > { %p2082_p2 = por %p2081_p1, %p2080_p0 }
 0x37d   : > { %p2083_p3 = pnand %p2082_p2, %p2078_p13 }
 0x37f   : > { %2086 = shalt.err (!%p2083_p3)
}
 0x380   : > { %1969 = dma.vmem_to_hbm [thread:$0]  (%p2376_p5), %s1559_s29, 128, %s1561_s30, %s2666_s0  }
 0x381   : > { %s1594_s18 = sshll.u32 %s1590_s23, 4  ;;  %s2680_s1 = scalar_lea.sflag [#allocation9], %s1504_s26  ;;  %s1595_s18 = int_to_ptr.hbm [resolvable:$true] %s1594_s18 }
 0x382   : > { %s2101_s2 = sshra.s32 %s1595_s18, 4  ;;  %s2107_s21 = scalar_lea.hbm %s2785_s15, 16  ;;  %s2102_s2 = int_to_ptr.hbm [resolvable:$true] %s2101_s2 }
 0x383   : > { %s2103_s17 = scalar_lea.hbm %s2102_s2, 8  ;;  %p2108_p9 = scmp.lt.s32.totalorder %s2102_s2, %s2785_s15 }
 0x384   : > { %p2104_p4 = scmp.ne.s32.totalorder %s2102_s2, %s2103_s17  ;;  %p2109_p10 = scmp.lt.s32.totalorder %s2107_s21, %s2103_s17 }
 0x386   : > { %p2105_p7 = pnand %p2104_p4, %p2376_p5  ;;  %p2110_p11 = por %p2109_p10, %p2108_p9 }
 0x388   : > { %p2106_p8 = pneg %p2105_p7 }
 0x38a   : > { %p2111_p12 = pnand %p2110_p11, %p2106_p8 }
 0x38c   : > { %2114 = shalt.err (!%p2111_p12)
}
 0x38d   : > { %1971 = dma.vmem_to_hbm [thread:$0]  (%p2376_p5), %s1593_s19, 128, %s1595_s18, %s2680_s1  }
 0x38e   : > { %s1542_s26 = scalar_lea.hbm %s2780_s10, %s2645_s5  ;;  %s2825_s29 = scalar_lea.vmem [#allocation3], %s2571_s25 }
 0x38f   : > { %s1544_s3 = sshll.u32 %s2825_s29, 4  ;;  %s1546_s2 = sshll.u32 %s1542_s26, 4  ;;  %s1545_s3 = int_to_ptr.vmem [resolvable:$true] %s1544_s3  ;;  %s1547_s2 = int_to_ptr.hbm [resolvable:$true] %s1546_s2 }
 0x390   : > { %s1576_s21 = scalar_lea.hbm %s2784_s14, %s2645_s5  ;;  %s1500_s24 = scalar_lea.sflag [#allocation4], %s2559_s4 }
 0x391   : > { %s2129_s28 = sshra.s32 %s1547_s2, 4  ;;  %s2135_s25 = scalar_lea.hbm %s2780_s10, 16  ;;  %s2130_s28 = int_to_ptr.hbm [resolvable:$true] %s2129_s28 }
 0x392   : > { %s2131_s7 = scalar_lea.hbm %s2130_s28, 8  ;;  %p2136_p2 = scmp.lt.s32.totalorder %s2130_s28, %s2780_s10 }
 0x393   : > { %p2132_p13 = scmp.ne.s32.totalorder %s2130_s28, %s2131_s7  ;;  %p2137_p3 = scmp.lt.s32.totalorder %s2135_s25, %s2131_s7 }
 0x395   : > { %p2133_p0 = pnand %p2132_p13, %p2376_p5  ;;  %p2138_p4 = por %p2137_p3, %p2136_p2 }
 0x397   : > { %p2134_p1 = pneg %p2133_p0 }
 0x399   : > { %p2139_p7 = pnand %p2138_p4, %p2134_p1 }
 0x39b   : > { %2142 = shalt.err (!%p2139_p7)
}
 0x39c   : > { %1968 = dma.vmem_to_hbm [thread:$0]  (%p2376_p5), %s1545_s3, 128, %s1547_s2, %s1500_s24  }
 0x39d   : > { %s1580_s5 = sshll.u32 %s1576_s21, 4  ;;  %s1603_s17 = scalar_lea.hbm %s2786_s16, %s2357_s9  ;;  %s1581_s5 = int_to_ptr.hbm [resolvable:$true] %s1580_s5 }
 0x39e   : > { %s2826_s6 = scalar_lea.vmem [#allocation10], %s2559_s4  ;;  %s2157_s28 = sshra.s32 %s1581_s5, 4  ;;  %s2158_s28 = int_to_ptr.hbm [resolvable:$true] %s2157_s28 }
 0x39f   : > { %s2720_s19 = sshll.u32 %s2826_s6, 4  ;;  %s2159_s7 = scalar_lea.hbm %s2158_s28, 8  ;;  %s1606_s19 = int_to_ptr.vmem [resolvable:$true] %s2720_s19 }
 0x3a0   : > { %p2160_p8 = scmp.ne.s32.totalorder %s2158_s28, %s2159_s7  ;;  %s2163_s3 = scalar_lea.hbm %s2784_s14, 16 }
 0x3a1   : > { %p2164_p11 = scmp.lt.s32.totalorder %s2158_s28, %s2784_s14  ;;  %p2165_p12 = scmp.lt.s32.totalorder %s2163_s3, %s2159_s7 }
 0x3a2   : > { %p2161_p9 = pnand %p2160_p8, %p2376_p5 }
 0x3a3   : > { %p2166_p13 = por %p2165_p12, %p2164_p11 }
 0x3a4   : > { %p2162_p10 = pneg %p2161_p9 }
 0x3a6   : > { %p2167_p0 = pnand %p2166_p13, %p2162_p10 }
 0x3a8   : > { %2170 = shalt.err (!%p2167_p0)
}
 0x3a9   : > { %s2827_s9 = sld [smem:[#allocation20_spill]]  ;;  %s1607_s24 = sshll.u32 %s1603_s17, 4  ;;  %s1608_s24 = int_to_ptr.hbm [resolvable:$true] %s1607_s24 }
 0x3aa   : > { %s2185_s30 = sshra.s32 %s1608_s24, 4  ;;  %s2191_s6 = scalar_lea.hbm %s2786_s16, 2  ;;  %s2186_s30 = int_to_ptr.hbm [resolvable:$true] %s2185_s30 }
 0x3ab   : > { %s2187_s23 = scalar_lea.hbm %s2186_s30, 1  ;;  %p2192_p4 = scmp.lt.s32.totalorder %s2186_s30, %s2786_s16 }
 0x3ac   : > { %p2188_p1 = scmp.ne.s32.totalorder %s2186_s30, %s2187_s23  ;;  %p2193_p7 = scmp.lt.s32.totalorder %s2191_s6, %s2187_s23 }
 0x3ae   : > { %p2189_p2 = pnand %p2188_p1, %p2376_p5  ;;  %p2194_p8 = por %p2193_p7, %p2192_p4 }
 0x3af   : > { %s2828_s4 = int_to_ptr.vmem [resolvable:$true] %s2827_s9 }
 0x3b0   : > { %1970 = dma.vmem_to_hbm [thread:$0]  (%p2376_p5), %s2828_s4, 128, %s1581_s5, %s2666_s0  }
 0x3b1   : > { %p2190_p3 = pneg %p2189_p2 }
 0x3b3   : > { %p2195_p9 = pnand %p2194_p8, %p2190_p3 }
 0x3b5   : > { %2198 = shalt.err (!%p2195_p9)
}
 0x3b6   : > { %1972 = dma.vmem_to_hbm [thread:$0]  (%p2376_p5), %s1606_s19, 16, %s1608_s24, %s2680_s1   ;;  %v1473_v58 = vld [vmem:[#allocation2] sm:$0x1]  ;;  %vm1497_vm12 = vcmask 0  }
 0x3b7   : > { %s2829_s17 = sld [smem:[#allocation29_spill]] }
 0x3bd   : > { %s651_s18 = scalar_lea.vmem %s2829_s17, %s2401_s22 }
 0x3f5   : > { %v1494_v59 = vpop.f32.mrf.mxu1 }
 0x3f6   : > { %v1495_v60 = vadd.f32 %v1494_v59, %v1473_v58 }
 0x3f8   : > { %1498 = vst.msk [vmem:[%s651_s18] sm:$0x1] %vm1497_vm12, %v1495_v60 }
 0x3f9 PF: > { %s2830_s25 = sld [smem:[#allocation16_spill]] }
 0x3fa   : > { %s2831_s3 = sld [smem:[#allocation14_spill]] }
 0x3ff   : > { %p1994_p10 = scmp.ge.s32.totalorder %s2830_s25, 2 }
 0x400   : > { %s1622_s21 = sand.u32 1, %s2831_s3  }
 0x401   : > { %p1979_p11 = pnand %p1994_p10, %p2380_p6  ;;  %s1623_s20 = scalar_lea.sflag [#allocation4], %s1622_s21 }
 0x403   : > { %p1980_p12 = pneg %p1979_p11 }
 0x405   : > { %2216 = dma.done.wait (%p1980_p12), %s1623_s20, 128  }
 0x406   : > { %2218 = vsyncadd (%p1980_p12), %s1623_s20, 4294967168  ;;  %s2833_s1 = sadd.s32 4294967294, %s2830_s25  }
 0x407   : > { %s1632_s19 = sand.u32 1, %s2833_s1  }
 0x408   : > { %s1633_s22 = scalar_lea.sflag [#allocation6], %s1632_s19 }
 0x409   : > { %2220 = dma.done.wait (%p1980_p12), %s1633_s22, 256  }
 0x40a   : > { %2222 = vsyncadd (%p1980_p12), %s1633_s22, 4294967040  ;;  %s1669_s9 = scalar_lea.sflag [#allocation9], %s1632_s19 }
 0x40b   : > { %2224 = dma.done.wait (%p1980_p12), %s1669_s9, 144  }
 0x40c   : > { %2226 = vsyncadd (%p1980_p12), %s1669_s9, 4294967152  ;;  %s2834_s29 = sld [smem:[#allocation17_spill]]  ;;  %s2837_s26 = smov %s2233_s27 }
 0x40d   : > { %s2835_s4 = sld [smem:[#allocation15_spill]] }
 0x40e   : > { %s2836_s28 = sld [smem:[#allocation18_spill]] }
 0x412   : > { %p36_p5 = scmp.ge.s32.totalorder %s2834_s29, 4  }
 0x413   : > { %s2838_s27 = smov %s2835_s4 }
 0x414   :  { %38 = sbr.rel (!%p36_p5) target bundleno = 17 (0x11), region = 205 }
 0x419   :  { %1690 = vsyncpa [#allocation4], 1 }
 0x41a   :  { %1692 = vsyncpa [#allocation4 + $0x1], 1 }
 0x41b   :  { %1693 = vsyncpa [#allocation6], 1 }
 0x41c   :  { %1695 = vsyncpa [#allocation6 + $0x1], 1 }
 0x41d   :  { %1696 = vsyncpa [#allocation9], 1 }
 0x41e   :  { %1698 = vsyncpa [#allocation9 + $0x1], 1 }

</bundles_post_ra>
